<compile_context>
chip_gen: v5e
topology: v5e:2x2
jax: 0.10.0
libtpu: 0.0.40
codegen_flags: <defaults>
</compile_context>

<pallas_src>
import numpy as np
import jax
import jax.numpy as jnp
from jax.experimental import pallas as pl
from jax.experimental.pallas import tpu as pltpu

_SQRT_HALF = 0.7071067811865476
_SIGN_MASK = np.int32(-2147483648)      # 0x80000000 bit pattern


def _erf(x):
    # Abramowitz & Stegun 7.1.26 rational approximation (|err| < 1.5e-7).
    # VALU-lean version: EUP reciprocal seed + 1 Newton step for the divide,
    # and a sign-bit OR instead of compare/select/multiply for the sign.
    p = 0.3275911
    a1, a2, a3, a4, a5 = (0.254829592, -0.284496736, 1.421413741,
                          -1.453152027, 1.061405429)
    ax = jnp.abs(x)
    u = 1.0 + p * ax
    t = pl.reciprocal(u, approx=True)        # EUP slot (nearly free)
    t = t * (2.0 - u * t)                    # one Newton step -> ~f32 exact
    poly = ((((a5 * t + a4) * t + a3) * t + a2) * t + a1) * t
    mag = 1.0 - poly * jnp.exp(-ax * ax)     # erf(|x|) >= 0
    # copysign(mag, x): OR the sign bit of x onto the magnitude result.
    sign = pltpu.bitcast(x, jnp.int32) & _SIGN_MASK
    return pltpu.bitcast(pltpu.bitcast(mag, jnp.int32) | sign, jnp.float32)


def _gelu(x):
    # exact (erf-based) GELU, matching torch.nn.functional.gelu default
    return 0.5 * x * (1.0 + _erf(x * _SQRT_HALF))


# --------------------------------------------------------------------------
# The single fused Pallas kernel (one batch tile per grid step)
# --------------------------------------------------------------------------
def _value_net_kernel(x_ref, w1_ref, b1_ref, w2_ref, b2_ref, w3_ref, b3_ref,
                      lw1_ref, lb1_ref, lw2_ref, lb2_ref, o_ref):
    # conv1 / conv2 / conv3 as dense GEMMs (+ bias + exact GELU)
    h = _gelu(jnp.dot(x_ref[...], w1_ref[...],
                      preferred_element_type=jnp.float32) + b1_ref[...])
    h = _gelu(jnp.dot(h, w2_ref[...],
                      preferred_element_type=jnp.float32) + b2_ref[...])
    h = _gelu(jnp.dot(h, w3_ref[...],
                      preferred_element_type=jnp.float32) + b3_ref[...])
    # 2x2 max-pool: the four window elements are contiguous 128-lane slabs.
    f = h.shape[1] // 4
    pooled = jnp.maximum(jnp.maximum(h[:, 0:f], h[:, f:2 * f]),
                         jnp.maximum(h[:, 2 * f:3 * f], h[:, 3 * f:4 * f]))
    # lin1 + GELU
    h = _gelu(jnp.dot(pooled, lw1_ref[...],
                      preferred_element_type=jnp.float32) + lb1_ref[...])
    # lin2 (N=1): broadcast-mul + lane reduce on VPU/XLU instead of a
    # 1-column MXU matmul (lw2 passed as a (1, 64) row).
    o_ref[...] = (jnp.sum(h * lw2_ref[...], axis=-1, keepdims=True)
                  + lb2_ref[...])


def _round_up(x, m):
    return (x + m - 1) // m * m


def value_net_forward(x_nchw, prep, *, tm=1024):
    b = x_nchw.shape[0]
    # NCHW flatten (ci*H*W + i*W + j) matches the dense conv matrix row order.
    x_flat = x_nchw.reshape(b, -1).astype(jnp.float32)
    in_dim = x_flat.shape[1]

    # Batch tile: <=1024 rows keeps per-step VMEM ~6 MiB (safe on the v5e
    # 16 MiB scoped default and v7x's 64 MiB physical VMEM); don't allocate a
    # bigger tile than the (sublane-rounded) batch actually needs.
    tm = int(min(tm, _round_up(b, 8)))
    grid = (pl.cdiv(b, tm),)

    row_map = lambda i: (i, 0)      # streamed per grid step
    fixed_map = lambda i: (0, 0)    # resident: fetched once, reused every step

    weights = (prep["w1"], prep["b1"], prep["w2"], prep["b2"],
               prep["w3"], prep["b3"], prep["lw1"], prep["lb1"],
               prep["lw2"], prep["lb2"])
    in_specs = ([pl.BlockSpec((tm, in_dim), row_map)]
                + [pl.BlockSpec(tuple(w.shape), fixed_map) for w in weights])
    out_specs = pl.BlockSpec((tm, 1), row_map)

    flops = 2 * b * sum(int(prep[k].shape[0] * prep[k].shape[1])
                        for k in ("w1", "w2", "w3", "lw1", "lw2"))
    transcendentals = b * int(prep["w1"].shape[1] + prep["w2"].shape[1]
                              + prep["w3"].shape[1] + prep["lw1"].shape[1])
    bytes_accessed = 4 * (int(x_flat.size)
                          + sum(int(np.prod(w.shape)) for w in weights) + b)

    return pl.pallas_call(
        _value_net_kernel,
        out_shape=jax.ShapeDtypeStruct((b, 1), jnp.float32),
        grid=grid,
        in_specs=in_specs,
        out_specs=out_specs,
        compiler_params=pltpu.CompilerParams(
            dimension_semantics=("parallel",)),
        cost_estimate=pl.CostEstimate(flops=flops,
                                      transcendentals=transcendentals,
                                      bytes_accessed=bytes_accessed),
    )(x_flat, *weights)


# --------------------------------------------------------------------------
# One-time (host-side) parameter preprocessing
# --------------------------------------------------------------------------
def _conv3x3_same_dense(w, H, W, out_col):
    """PyTorch (Cout, Cin, 3, 3) conv weight -> dense (Cin*H*W, Cout*H*W)
    matrix for a 3x3 SAME conv. Input rows use NCHW flatten order
    ci*H*W + i*W + j; output column for (co, i, j) is out_col(co, i, j)."""
    w = np.asarray(w, np.float32)
    cout, cin = w.shape[0], w.shape[1]
    mat = np.zeros((cin * H * W, cout * H * W), np.float32)
    for i in range(H):
        for j in range(W):
            oc = np.array([out_col(co, i, j) for co in range(cout)])
            for kh in range(3):
                ii = i + kh - 1
                if not (0 <= ii < H):
                    continue
                for kw in range(3):
                    jj = j + kw - 1
                    if not (0 <= jj < W):
                        continue
                    rows = np.arange(cin) * H * W + ii * W + jj
                    mat[np.ix_(rows, oc)] += w[:, :, kh, kw].T
    return mat


def prepare_params(params, board_size=4):
    """Build GEMM-layout weights once (not re-emitted per forward)."""
    H = W = board_size
    pH, pW = H // 2, W // 2
    cout3 = int(np.asarray(params["conv3_w"]).shape[0])

    def nchw_col(co, i, j):
        return co * H * W + i * W + j

    def pool_col(co, i, j):
        # column = window_elem * (C*pH*pW) + PyTorch-flatten(c, pi, pj)
        pi, di = i // 2, i % 2
        pj, dj = j // 2, j % 2
        k = di * 2 + dj
        return k * (cout3 * pH * pW) + co * pH * pW + pi * pW + pj

    c1 = np.asarray(params["conv1_b"], np.float32)
    c2 = np.asarray(params["conv2_b"], np.float32)
    c3 = np.asarray(params["conv3_b"], np.float32)
    prep = {
        "w1": _conv3x3_same_dense(params["conv1_w"], H, W, nchw_col),
        "b1": np.repeat(c1, H * W)[None, :],
        "w2": _conv3x3_same_dense(params["conv2_w"], H, W, nchw_col),
        "b2": np.repeat(c2, H * W)[None, :],
        "w3": _conv3x3_same_dense(params["conv3_w"], H, W, pool_col),
        "b3": np.tile(np.repeat(c3, pH * pW), 4)[None, :],
        "lw1": np.asarray(params["lin1_w"], np.float32).T,
        "lb1": np.asarray(params["lin1_b"], np.float32)[None, :],
        "lw2": np.asarray(params["lin2_w"], np.float32),       # (1, 64) row
        "lb2": np.asarray(params["lin2_b"], np.float32)[None, :],
    }
    return {k: jnp.asarray(v) for k, v in prep.items()}


def init_params(key, board_size=4):
    """Deterministic synthetic init mirroring nn.Conv2d / nn.Linear shapes."""
    ks = jax.random.split(key, 10)

    def u(k, shape, fan_in):
        bound = 1.0 / np.sqrt(float(fan_in))
        return jax.random.uniform(k, shape, jnp.float32, -bound, bound)

    feat = 32 * (board_size // 2) ** 2
    return {
        "conv1_w": u(ks[0], (16, 2, 3, 3), 2 * 9),
        "conv1_b": u(ks[1], (16,), 2 * 9),
        "conv2_w": u(ks[2], (16, 16, 3, 3), 16 * 9),
        "conv2_b": u(ks[3], (16,), 16 * 9),
        "conv3_w": u(ks[4], (32, 16, 3, 3), 16 * 9),
        "conv3_b": u(ks[5], (32,), 16 * 9),
        "lin1_w": u(ks[6], (64, feat), feat),
        "lin1_b": u(ks[7], (64,), feat),
        "lin2_w": u(ks[8], (1, 64), 64),
        "lin2_b": u(ks[9], (1,), 64),
    }


# --------------------------------------------------------------------------
# Pure-JAX reference (mirrors the PyTorch ValueNet.forward) for sanity check
# --------------------------------------------------------------------------
def reference_forward(x_nchw, params):
    def conv(x, w, bias):
        y = jax.lax.conv_general_dilated(
            x, w, window_strides=(1, 1), padding="SAME",
            dimension_numbers=("NCHW", "OIHW", "NCHW"))
        return y + bias[None, :, None, None]

    g = lambda v: jax.nn.gelu(v, approximate=False)
    x = g(conv(x_nchw, params["conv1_w"], params["conv1_b"]))
    x = g(conv(x, params["conv2_w"], params["conv2_b"]))
    x = g(conv(x, params["conv3_w"], params["conv3_b"]))
    b, c, h, w = x.shape
    x = x.reshape(b, c, h // 2, 2, w // 2, 2).max(axis=(3, 5))
    x = x.reshape(b, -1)
    x = g(x @ params["lin1_w"].T + params["lin1_b"])
    return x @ params["lin2_w"].T + params["lin2_b"]


if __name__ == "__main__":
    board_size = 4
    batch = 2
    key = jax.random.PRNGKey(0)
    k_x, k_p, k_x2 = jax.random.split(key, 3)

    x = jax.random.normal(k_x, (batch, 2, board_size, board_size), jnp.float32)
    params = init_params(k_p, board_size)
    prep = prepare_params(params, board_size)   # once, off the hot path

    fwd = jax.jit(value_net_forward, static_argnames=("tm",))
    out = jax.block_until_ready(fwd(x, prep))

    ref = reference_forward(x, params)
    assert out.shape == (batch, 1)
    # tolerance slightly looser than 1e-4: the EUP-seeded reciprocal (refined
    # by one Newton step) is the only numerics delta vs the exact-erf path.
    assert jnp.allclose(out, ref, atol=2e-4, rtol=2e-4), (out, ref)

    # Exercise a multi-step batch grid with a partial final block (40 / 16).
    x2 = jax.random.normal(k_x2, (40, 2, board_size, board_size), jnp.float32)
    out2 = jax.block_until_ready(fwd(x2, prep, tm=16))
    ref2 = reference_forward(x2, params)
    assert out2.shape == (40, 1)
    assert jnp.allclose(out2, ref2, atol=2e-4, rtol=2e-4), (out2, ref2)

    print("KERNEL_OK")
</pallas_src>

<mosaic_0001>
module attributes {stable_mosaic.version = 11 : i64} {
  func.func @_value_net_kernel(%arg0: i32, %arg1: memref<8x32xf32, #tpu.memory_space<vmem>>, %arg2: memref<32x256xf32, #tpu.memory_space<vmem>>, %arg3: memref<1x256xf32, #tpu.memory_space<vmem>>, %arg4: memref<256x256xf32, #tpu.memory_space<vmem>>, %arg5: memref<1x256xf32, #tpu.memory_space<vmem>>, %arg6: memref<256x512xf32, #tpu.memory_space<vmem>>, %arg7: memref<1x512xf32, #tpu.memory_space<vmem>>, %arg8: memref<128x64xf32, #tpu.memory_space<vmem>>, %arg9: memref<1x64xf32, #tpu.memory_space<vmem>>, %arg10: memref<1x64xf32, #tpu.memory_space<vmem>>, %arg11: memref<1x1xf32, #tpu.memory_space<vmem>>, %arg12: memref<8x1xf32, #tpu.memory_space<vmem>>) attributes {dimension_semantics = [#tpu.dimension_semantics<parallel>], iteration_bounds = array<i64: 1>, scalar_prefetch = 0 : i64, scratch_operands = 0 : i64, tpu.core_type = #tpu.core_type<tc>, window_params = [{transform_indices = @transform_0, window_bounds = array<i64: 8, 32>}, {pipeline_mode = #tpu.pipeline_mode<synchronous>, transform_indices = @transform_1, window_bounds = array<i64: 32, 256>}, {pipeline_mode = #tpu.pipeline_mode<synchronous>, transform_indices = @transform_2, window_bounds = array<i64: 1, 256>}, {pipeline_mode = #tpu.pipeline_mode<synchronous>, transform_indices = @transform_3, window_bounds = array<i64: 256, 256>}, {pipeline_mode = #tpu.pipeline_mode<synchronous>, transform_indices = @transform_4, window_bounds = array<i64: 1, 256>}, {pipeline_mode = #tpu.pipeline_mode<synchronous>, transform_indices = @transform_5, window_bounds = array<i64: 256, 512>}, {pipeline_mode = #tpu.pipeline_mode<synchronous>, transform_indices = @transform_6, window_bounds = array<i64: 1, 512>}, {pipeline_mode = #tpu.pipeline_mode<synchronous>, transform_indices = @transform_7, window_bounds = array<i64: 128, 64>}, {pipeline_mode = #tpu.pipeline_mode<synchronous>, transform_indices = @transform_8, window_bounds = array<i64: 1, 64>}, {pipeline_mode = #tpu.pipeline_mode<synchronous>, transform_indices = @transform_9, window_bounds = array<i64: 1, 64>}, {pipeline_mode = #tpu.pipeline_mode<synchronous>, transform_indices = @transform_10, window_bounds = array<i64: 1, 1>}, {transform_indices = @transform_11, window_bounds = array<i64: 8, 1>}]} {
    %c0 = arith.constant 0 : index
    %c0_0 = arith.constant 0 : index
    %0 = vector.load %arg1[%c0, %c0_0] : memref<8x32xf32, #tpu.memory_space<vmem>>, vector<8x32xf32>
    %c0_1 = arith.constant 0 : index
    %c0_2 = arith.constant 0 : index
    %1 = vector.load %arg2[%c0_1, %c0_2] : memref<32x256xf32, #tpu.memory_space<vmem>>, vector<32x256xf32>
    %cst = arith.constant dense<0.000000e+00> : vector<8x256xf32>
    %2 = tpu.matmul %0, %1, %cst {dimension_numbers = #tpu.dot_dimension_numbers<[1], [0], [0], [1], [0, 0, 1, 1], [], []>} : vector<8x32xf32>, vector<32x256xf32>, vector<8x256xf32> -> vector<8x256xf32>
    %c0_3 = arith.constant 0 : index
    %c0_4 = arith.constant 0 : index
    %3 = vector.load %arg3[%c0_3, %c0_4] : memref<1x256xf32, #tpu.memory_space<vmem>>, vector<1x256xf32>
    %4 = vector.broadcast %3 : vector<1x256xf32> to vector<8x256xf32>
    %5 = arith.addf %2, %4 : vector<8x256xf32>
    %cst_5 = arith.constant 5.000000e-01 : f32
    %6 = vector.broadcast %cst_5 : f32 to vector<8x256xf32>
    %7 = arith.mulf %6, %5 : vector<8x256xf32>
    %cst_6 = arith.constant 0.707106769 : f32
    %8 = vector.broadcast %cst_6 : f32 to vector<8x256xf32>
    %9 = arith.mulf %5, %8 : vector<8x256xf32>
    %10 = math.absf %9 : vector<8x256xf32>
    %cst_7 = arith.constant 0.327591091 : f32
    %11 = vector.broadcast %cst_7 : f32 to vector<8x256xf32>
    %12 = arith.mulf %11, %10 : vector<8x256xf32>
    %cst_8 = arith.constant 1.000000e+00 : f32
    %13 = vector.broadcast %cst_8 : f32 to vector<8x256xf32>
    %14 = arith.addf %13, %12 : vector<8x256xf32>
    %15 = tpu.reciprocal %14 {approx = true} : vector<8x256xf32> -> vector<8x256xf32>
    %16 = arith.mulf %14, %15 : vector<8x256xf32>
    %cst_9 = arith.constant 2.000000e+00 : f32
    %17 = vector.broadcast %cst_9 : f32 to vector<8x256xf32>
    %18 = arith.subf %17, %16 : vector<8x256xf32>
    %19 = arith.mulf %15, %18 : vector<8x256xf32>
    %cst_10 = arith.constant 1.06140542 : f32
    %20 = vector.broadcast %cst_10 : f32 to vector<8x256xf32>
    %21 = arith.mulf %20, %19 : vector<8x256xf32>
    %cst_11 = arith.constant -1.45315206 : f32
    %22 = vector.broadcast %cst_11 : f32 to vector<8x256xf32>
    %23 = arith.addf %21, %22 : vector<8x256xf32>
    %24 = arith.mulf %23, %19 : vector<8x256xf32>
    %cst_12 = arith.constant 1.42141378 : f32
    %25 = vector.broadcast %cst_12 : f32 to vector<8x256xf32>
    %26 = arith.addf %24, %25 : vector<8x256xf32>
    %27 = arith.mulf %26, %19 : vector<8x256xf32>
    %cst_13 = arith.constant -0.284496725 : f32
    %28 = vector.broadcast %cst_13 : f32 to vector<8x256xf32>
    %29 = arith.addf %27, %28 : vector<8x256xf32>
    %30 = arith.mulf %29, %19 : vector<8x256xf32>
    %cst_14 = arith.constant 0.254829586 : f32
    %31 = vector.broadcast %cst_14 : f32 to vector<8x256xf32>
    %32 = arith.addf %30, %31 : vector<8x256xf32>
    %33 = arith.mulf %32, %19 : vector<8x256xf32>
    %cst_15 = arith.constant 0.000000e+00 : f32
    %34 = vector.broadcast %cst_15 : f32 to vector<8x256xf32>
    %35 = arith.subf %34, %10 : vector<8x256xf32>
    %36 = arith.mulf %35, %10 : vector<8x256xf32>
    %37 = math.exp %36 : vector<8x256xf32>
    %38 = arith.mulf %33, %37 : vector<8x256xf32>
    %cst_16 = arith.constant 1.000000e+00 : f32
    %39 = vector.broadcast %cst_16 : f32 to vector<8x256xf32>
    %40 = arith.subf %39, %38 : vector<8x256xf32>
    %41 = tpu.bitcast %9 : vector<8x256xf32> -> vector<8x256xi32>
    %c-2147483648_i32 = arith.constant -2147483648 : i32
    %42 = vector.broadcast %c-2147483648_i32 : i32 to vector<8x256xi32>
    %43 = arith.andi %41, %42 : vector<8x256xi32>
    %44 = tpu.bitcast %40 : vector<8x256xf32> -> vector<8x256xi32>
    %45 = arith.ori %44, %43 : vector<8x256xi32>
    %46 = tpu.bitcast %45 : vector<8x256xi32> -> vector<8x256xf32>
    %cst_17 = arith.constant 1.000000e+00 : f32
    %47 = vector.broadcast %cst_17 : f32 to vector<8x256xf32>
    %48 = arith.addf %47, %46 : vector<8x256xf32>
    %49 = arith.mulf %7, %48 : vector<8x256xf32>
    %c0_18 = arith.constant 0 : index
    %c0_19 = arith.constant 0 : index
    %50 = vector.load %arg4[%c0_18, %c0_19] : memref<256x256xf32, #tpu.memory_space<vmem>>, vector<256x256xf32>
    %cst_20 = arith.constant dense<0.000000e+00> : vector<8x256xf32>
    %51 = tpu.matmul %49, %50, %cst_20 {dimension_numbers = #tpu.dot_dimension_numbers<[1], [0], [0], [1], [0, 0, 1, 1], [], []>} : vector<8x256xf32>, vector<256x256xf32>, vector<8x256xf32> -> vector<8x256xf32>
    %c0_21 = arith.constant 0 : index
    %c0_22 = arith.constant 0 : index
    %52 = vector.load %arg5[%c0_21, %c0_22] : memref<1x256xf32, #tpu.memory_space<vmem>>, vector<1x256xf32>
    %53 = vector.broadcast %52 : vector<1x256xf32> to vector<8x256xf32>
    %54 = arith.addf %51, %53 : vector<8x256xf32>
    %cst_23 = arith.constant 5.000000e-01 : f32
    %55 = vector.broadcast %cst_23 : f32 to vector<8x256xf32>
    %56 = arith.mulf %55, %54 : vector<8x256xf32>
    %cst_24 = arith.constant 0.707106769 : f32
    %57 = vector.broadcast %cst_24 : f32 to vector<8x256xf32>
    %58 = arith.mulf %54, %57 : vector<8x256xf32>
    %59 = math.absf %58 : vector<8x256xf32>
    %cst_25 = arith.constant 0.327591091 : f32
    %60 = vector.broadcast %cst_25 : f32 to vector<8x256xf32>
    %61 = arith.mulf %60, %59 : vector<8x256xf32>
    %cst_26 = arith.constant 1.000000e+00 : f32
    %62 = vector.broadcast %cst_26 : f32 to vector<8x256xf32>
    %63 = arith.addf %62, %61 : vector<8x256xf32>
    %64 = tpu.reciprocal %63 {approx = true} : vector<8x256xf32> -> vector<8x256xf32>
    %65 = arith.mulf %63, %64 : vector<8x256xf32>
    %cst_27 = arith.constant 2.000000e+00 : f32
    %66 = vector.broadcast %cst_27 : f32 to vector<8x256xf32>
    %67 = arith.subf %66, %65 : vector<8x256xf32>
    %68 = arith.mulf %64, %67 : vector<8x256xf32>
    %cst_28 = arith.constant 1.06140542 : f32
    %69 = vector.broadcast %cst_28 : f32 to vector<8x256xf32>
    %70 = arith.mulf %69, %68 : vector<8x256xf32>
    %cst_29 = arith.constant -1.45315206 : f32
    %71 = vector.broadcast %cst_29 : f32 to vector<8x256xf32>
    %72 = arith.addf %70, %71 : vector<8x256xf32>
    %73 = arith.mulf %72, %68 : vector<8x256xf32>
    %cst_30 = arith.constant 1.42141378 : f32
    %74 = vector.broadcast %cst_30 : f32 to vector<8x256xf32>
    %75 = arith.addf %73, %74 : vector<8x256xf32>
    %76 = arith.mulf %75, %68 : vector<8x256xf32>
    %cst_31 = arith.constant -0.284496725 : f32
    %77 = vector.broadcast %cst_31 : f32 to vector<8x256xf32>
    %78 = arith.addf %76, %77 : vector<8x256xf32>
    %79 = arith.mulf %78, %68 : vector<8x256xf32>
    %cst_32 = arith.constant 0.254829586 : f32
    %80 = vector.broadcast %cst_32 : f32 to vector<8x256xf32>
    %81 = arith.addf %79, %80 : vector<8x256xf32>
    %82 = arith.mulf %81, %68 : vector<8x256xf32>
    %cst_33 = arith.constant 0.000000e+00 : f32
    %83 = vector.broadcast %cst_33 : f32 to vector<8x256xf32>
    %84 = arith.subf %83, %59 : vector<8x256xf32>
    %85 = arith.mulf %84, %59 : vector<8x256xf32>
    %86 = math.exp %85 : vector<8x256xf32>
    %87 = arith.mulf %82, %86 : vector<8x256xf32>
    %cst_34 = arith.constant 1.000000e+00 : f32
    %88 = vector.broadcast %cst_34 : f32 to vector<8x256xf32>
    %89 = arith.subf %88, %87 : vector<8x256xf32>
    %90 = tpu.bitcast %58 : vector<8x256xf32> -> vector<8x256xi32>
    %c-2147483648_i32_35 = arith.constant -2147483648 : i32
    %91 = vector.broadcast %c-2147483648_i32_35 : i32 to vector<8x256xi32>
    %92 = arith.andi %90, %91 : vector<8x256xi32>
    %93 = tpu.bitcast %89 : vector<8x256xf32> -> vector<8x256xi32>
    %94 = arith.ori %93, %92 : vector<8x256xi32>
    %95 = tpu.bitcast %94 : vector<8x256xi32> -> vector<8x256xf32>
    %cst_36 = arith.constant 1.000000e+00 : f32
    %96 = vector.broadcast %cst_36 : f32 to vector<8x256xf32>
    %97 = arith.addf %96, %95 : vector<8x256xf32>
    %98 = arith.mulf %56, %97 : vector<8x256xf32>
    %c0_37 = arith.constant 0 : index
    %c0_38 = arith.constant 0 : index
    %99 = vector.load %arg6[%c0_37, %c0_38] : memref<256x512xf32, #tpu.memory_space<vmem>>, vector<256x512xf32>
    %cst_39 = arith.constant dense<0.000000e+00> : vector<8x512xf32>
    %100 = tpu.matmul %98, %99, %cst_39 {dimension_numbers = #tpu.dot_dimension_numbers<[1], [0], [0], [1], [0, 0, 1, 1], [], []>} : vector<8x256xf32>, vector<256x512xf32>, vector<8x512xf32> -> vector<8x512xf32>
    %c0_40 = arith.constant 0 : index
    %c0_41 = arith.constant 0 : index
    %101 = vector.load %arg7[%c0_40, %c0_41] : memref<1x512xf32, #tpu.memory_space<vmem>>, vector<1x512xf32>
    %102 = vector.broadcast %101 : vector<1x512xf32> to vector<8x512xf32>
    %103 = arith.addf %100, %102 : vector<8x512xf32>
    %cst_42 = arith.constant 5.000000e-01 : f32
    %104 = vector.broadcast %cst_42 : f32 to vector<8x512xf32>
    %105 = arith.mulf %104, %103 : vector<8x512xf32>
    %cst_43 = arith.constant 0.707106769 : f32
    %106 = vector.broadcast %cst_43 : f32 to vector<8x512xf32>
    %107 = arith.mulf %103, %106 : vector<8x512xf32>
    %108 = math.absf %107 : vector<8x512xf32>
    %cst_44 = arith.constant 0.327591091 : f32
    %109 = vector.broadcast %cst_44 : f32 to vector<8x512xf32>
    %110 = arith.mulf %109, %108 : vector<8x512xf32>
    %cst_45 = arith.constant 1.000000e+00 : f32
    %111 = vector.broadcast %cst_45 : f32 to vector<8x512xf32>
    %112 = arith.addf %111, %110 : vector<8x512xf32>
    %113 = tpu.reciprocal %112 {approx = true} : vector<8x512xf32> -> vector<8x512xf32>
    %114 = arith.mulf %112, %113 : vector<8x512xf32>
    %cst_46 = arith.constant 2.000000e+00 : f32
    %115 = vector.broadcast %cst_46 : f32 to vector<8x512xf32>
    %116 = arith.subf %115, %114 : vector<8x512xf32>
    %117 = arith.mulf %113, %116 : vector<8x512xf32>
    %cst_47 = arith.constant 1.06140542 : f32
    %118 = vector.broadcast %cst_47 : f32 to vector<8x512xf32>
    %119 = arith.mulf %118, %117 : vector<8x512xf32>
    %cst_48 = arith.constant -1.45315206 : f32
    %120 = vector.broadcast %cst_48 : f32 to vector<8x512xf32>
    %121 = arith.addf %119, %120 : vector<8x512xf32>
    %122 = arith.mulf %121, %117 : vector<8x512xf32>
    %cst_49 = arith.constant 1.42141378 : f32
    %123 = vector.broadcast %cst_49 : f32 to vector<8x512xf32>
    %124 = arith.addf %122, %123 : vector<8x512xf32>
    %125 = arith.mulf %124, %117 : vector<8x512xf32>
    %cst_50 = arith.constant -0.284496725 : f32
    %126 = vector.broadcast %cst_50 : f32 to vector<8x512xf32>
    %127 = arith.addf %125, %126 : vector<8x512xf32>
    %128 = arith.mulf %127, %117 : vector<8x512xf32>
    %cst_51 = arith.constant 0.254829586 : f32
    %129 = vector.broadcast %cst_51 : f32 to vector<8x512xf32>
    %130 = arith.addf %128, %129 : vector<8x512xf32>
    %131 = arith.mulf %130, %117 : vector<8x512xf32>
    %cst_52 = arith.constant 0.000000e+00 : f32
    %132 = vector.broadcast %cst_52 : f32 to vector<8x512xf32>
    %133 = arith.subf %132, %108 : vector<8x512xf32>
    %134 = arith.mulf %133, %108 : vector<8x512xf32>
    %135 = math.exp %134 : vector<8x512xf32>
    %136 = arith.mulf %131, %135 : vector<8x512xf32>
    %cst_53 = arith.constant 1.000000e+00 : f32
    %137 = vector.broadcast %cst_53 : f32 to vector<8x512xf32>
    %138 = arith.subf %137, %136 : vector<8x512xf32>
    %139 = tpu.bitcast %107 : vector<8x512xf32> -> vector<8x512xi32>
    %c-2147483648_i32_54 = arith.constant -2147483648 : i32
    %140 = vector.broadcast %c-2147483648_i32_54 : i32 to vector<8x512xi32>
    %141 = arith.andi %139, %140 : vector<8x512xi32>
    %142 = tpu.bitcast %138 : vector<8x512xf32> -> vector<8x512xi32>
    %143 = arith.ori %142, %141 : vector<8x512xi32>
    %144 = tpu.bitcast %143 : vector<8x512xi32> -> vector<8x512xf32>
    %cst_55 = arith.constant 1.000000e+00 : f32
    %145 = vector.broadcast %cst_55 : f32 to vector<8x512xf32>
    %146 = arith.addf %145, %144 : vector<8x512xf32>
    %147 = arith.mulf %105, %146 : vector<8x512xf32>
    %148 = vector.extract_strided_slice %147 {offsets = [0, 0], sizes = [8, 128], strides = [1, 1]} : vector<8x512xf32> to vector<8x128xf32>
    %149 = vector.extract_strided_slice %147 {offsets = [0, 128], sizes = [8, 128], strides = [1, 1]} : vector<8x512xf32> to vector<8x128xf32>
    %150 = arith.maximumf %148, %149 : vector<8x128xf32>
    %151 = vector.extract_strided_slice %147 {offsets = [0, 256], sizes = [8, 128], strides = [1, 1]} : vector<8x512xf32> to vector<8x128xf32>
    %152 = vector.extract_strided_slice %147 {offsets = [0, 384], sizes = [8, 128], strides = [1, 1]} : vector<8x512xf32> to vector<8x128xf32>
    %153 = arith.maximumf %151, %152 : vector<8x128xf32>
    %154 = arith.maximumf %150, %153 : vector<8x128xf32>
    %c0_56 = arith.constant 0 : index
    %c0_57 = arith.constant 0 : index
    %155 = vector.load %arg8[%c0_56, %c0_57] : memref<128x64xf32, #tpu.memory_space<vmem>>, vector<128x64xf32>
    %cst_58 = arith.constant dense<0.000000e+00> : vector<8x64xf32>
    %156 = tpu.matmul %154, %155, %cst_58 {dimension_numbers = #tpu.dot_dimension_numbers<[1], [0], [0], [1], [0, 0, 1, 1], [], []>} : vector<8x128xf32>, vector<128x64xf32>, vector<8x64xf32> -> vector<8x64xf32>
    %c0_59 = arith.constant 0 : index
    %c0_60 = arith.constant 0 : index
    %157 = vector.load %arg9[%c0_59, %c0_60] : memref<1x64xf32, #tpu.memory_space<vmem>>, vector<1x64xf32>
    %158 = vector.broadcast %157 : vector<1x64xf32> to vector<8x64xf32>
    %159 = arith.addf %156, %158 : vector<8x64xf32>
    %cst_61 = arith.constant 5.000000e-01 : f32
    %160 = vector.broadcast %cst_61 : f32 to vector<8x64xf32>
    %161 = arith.mulf %160, %159 : vector<8x64xf32>
    %cst_62 = arith.constant 0.707106769 : f32
    %162 = vector.broadcast %cst_62 : f32 to vector<8x64xf32>
    %163 = arith.mulf %159, %162 : vector<8x64xf32>
    %164 = math.absf %163 : vector<8x64xf32>
    %cst_63 = arith.constant 0.327591091 : f32
    %165 = vector.broadcast %cst_63 : f32 to vector<8x64xf32>
    %166 = arith.mulf %165, %164 : vector<8x64xf32>
    %cst_64 = arith.constant 1.000000e+00 : f32
    %167 = vector.broadcast %cst_64 : f32 to vector<8x64xf32>
    %168 = arith.addf %167, %166 : vector<8x64xf32>
    %169 = tpu.reciprocal %168 {approx = true} : vector<8x64xf32> -> vector<8x64xf32>
    %170 = arith.mulf %168, %169 : vector<8x64xf32>
    %cst_65 = arith.constant 2.000000e+00 : f32
    %171 = vector.broadcast %cst_65 : f32 to vector<8x64xf32>
    %172 = arith.subf %171, %170 : vector<8x64xf32>
    %173 = arith.mulf %169, %172 : vector<8x64xf32>
    %cst_66 = arith.constant 1.06140542 : f32
    %174 = vector.broadcast %cst_66 : f32 to vector<8x64xf32>
    %175 = arith.mulf %174, %173 : vector<8x64xf32>
    %cst_67 = arith.constant -1.45315206 : f32
    %176 = vector.broadcast %cst_67 : f32 to vector<8x64xf32>
    %177 = arith.addf %175, %176 : vector<8x64xf32>
    %178 = arith.mulf %177, %173 : vector<8x64xf32>
    %cst_68 = arith.constant 1.42141378 : f32
    %179 = vector.broadcast %cst_68 : f32 to vector<8x64xf32>
    %180 = arith.addf %178, %179 : vector<8x64xf32>
    %181 = arith.mulf %180, %173 : vector<8x64xf32>
    %cst_69 = arith.constant -0.284496725 : f32
    %182 = vector.broadcast %cst_69 : f32 to vector<8x64xf32>
    %183 = arith.addf %181, %182 : vector<8x64xf32>
    %184 = arith.mulf %183, %173 : vector<8x64xf32>
    %cst_70 = arith.constant 0.254829586 : f32
    %185 = vector.broadcast %cst_70 : f32 to vector<8x64xf32>
    %186 = arith.addf %184, %185 : vector<8x64xf32>
    %187 = arith.mulf %186, %173 : vector<8x64xf32>
    %cst_71 = arith.constant 0.000000e+00 : f32
    %188 = vector.broadcast %cst_71 : f32 to vector<8x64xf32>
    %189 = arith.subf %188, %164 : vector<8x64xf32>
    %190 = arith.mulf %189, %164 : vector<8x64xf32>
    %191 = math.exp %190 : vector<8x64xf32>
    %192 = arith.mulf %187, %191 : vector<8x64xf32>
    %cst_72 = arith.constant 1.000000e+00 : f32
    %193 = vector.broadcast %cst_72 : f32 to vector<8x64xf32>
    %194 = arith.subf %193, %192 : vector<8x64xf32>
    %195 = tpu.bitcast %163 : vector<8x64xf32> -> vector<8x64xi32>
    %c-2147483648_i32_73 = arith.constant -2147483648 : i32
    %196 = vector.broadcast %c-2147483648_i32_73 : i32 to vector<8x64xi32>
    %197 = arith.andi %195, %196 : vector<8x64xi32>
    %198 = tpu.bitcast %194 : vector<8x64xf32> -> vector<8x64xi32>
    %199 = arith.ori %198, %197 : vector<8x64xi32>
    %200 = tpu.bitcast %199 : vector<8x64xi32> -> vector<8x64xf32>
    %cst_74 = arith.constant 1.000000e+00 : f32
    %201 = vector.broadcast %cst_74 : f32 to vector<8x64xf32>
    %202 = arith.addf %201, %200 : vector<8x64xf32>
    %203 = arith.mulf %161, %202 : vector<8x64xf32>
    %c0_75 = arith.constant 0 : index
    %c0_76 = arith.constant 0 : index
    %204 = vector.load %arg10[%c0_75, %c0_76] : memref<1x64xf32, #tpu.memory_space<vmem>>, vector<1x64xf32>
    %205 = vector.broadcast %204 : vector<1x64xf32> to vector<8x64xf32>
    %206 = arith.mulf %203, %205 : vector<8x64xf32>
    %cst_77 = arith.constant dense<0.000000e+00> : vector<8xf32>
    %207 = vector.multi_reduction <add>, %206, %cst_77 [1] : vector<8x64xf32> to vector<8xf32>
    %208 = vector.shape_cast %207 : vector<8xf32> to vector<8x1xf32>
    %c0_78 = arith.constant 0 : index
    %c0_79 = arith.constant 0 : index
    %209 = vector.load %arg11[%c0_78, %c0_79] : memref<1x1xf32, #tpu.memory_space<vmem>>, vector<1x1xf32>
    %210 = vector.broadcast %209 : vector<1x1xf32> to vector<8x1xf32>
    %211 = arith.addf %208, %210 : vector<8x1xf32>
    %c0_80 = arith.constant 0 : index
    %c0_81 = arith.constant 0 : index
    %212 = vector.load %arg12[%c0_80, %c0_81] : memref<8x1xf32, #tpu.memory_space<vmem>>, vector<8x1xf32>
    tpu.vector_store %arg12[%c0_80, %c0_81], %211 {strides = array<i32>} : memref<8x1xf32, #tpu.memory_space<vmem>>, vector<8x1xf32>,
    return
  }
  func.func @transform_0(%arg0: i32) -> (i32, i32) {
    %c0_i32 = arith.constant 0 : i32
    %c0_i32_0 = arith.constant 0 : i32
    return %arg0, %c0_i32 : i32, i32
  }
  func.func @transform_1(%arg0: i32) -> (i32, i32) {
    %c0_i32 = arith.constant 0 : i32
    %c0_i32_0 = arith.constant 0 : i32
    %c0_i32_1 = arith.constant 0 : i32
    return %c0_i32, %c0_i32_0 : i32, i32
  }
  func.func @transform_2(%arg0: i32) -> (i32, i32) {
    %c0_i32 = arith.constant 0 : i32
    %c0_i32_0 = arith.constant 0 : i32
    %c0_i32_1 = arith.constant 0 : i32
    return %c0_i32, %c0_i32_0 : i32, i32
  }
  func.func @transform_3(%arg0: i32) -> (i32, i32) {
    %c0_i32 = arith.constant 0 : i32
    %c0_i32_0 = arith.constant 0 : i32
    %c0_i32_1 = arith.constant 0 : i32
    return %c0_i32, %c0_i32_0 : i32, i32
  }
  func.func @transform_4(%arg0: i32) -> (i32, i32) {
    %c0_i32 = arith.constant 0 : i32
    %c0_i32_0 = arith.constant 0 : i32
    %c0_i32_1 = arith.constant 0 : i32
    return %c0_i32, %c0_i32_0 : i32, i32
  }
  func.func @transform_5(%arg0: i32) -> (i32, i32) {
    %c0_i32 = arith.constant 0 : i32
    %c0_i32_0 = arith.constant 0 : i32
    %c0_i32_1 = arith.constant 0 : i32
    return %c0_i32, %c0_i32_0 : i32, i32
  }
  func.func @transform_6(%arg0: i32) -> (i32, i32) {
    %c0_i32 = arith.constant 0 : i32
    %c0_i32_0 = arith.constant 0 : i32
    %c0_i32_1 = arith.constant 0 : i32
    return %c0_i32, %c0_i32_0 : i32, i32
  }
  func.func @transform_7(%arg0: i32) -> (i32, i32) {
    %c0_i32 = arith.constant 0 : i32
    %c0_i32_0 = arith.constant 0 : i32
    %c0_i32_1 = arith.constant 0 : i32
    return %c0_i32, %c0_i32_0 : i32, i32
  }
  func.func @transform_8(%arg0: i32) -> (i32, i32) {
    %c0_i32 = arith.constant 0 : i32
    %c0_i32_0 = arith.constant 0 : i32
    %c0_i32_1 = arith.constant 0 : i32
    return %c0_i32, %c0_i32_0 : i32, i32
  }
  func.func @transform_9(%arg0: i32) -> (i32, i32) {
    %c0_i32 = arith.constant 0 : i32
    %c0_i32_0 = arith.constant 0 : i32
    %c0_i32_1 = arith.constant 0 : i32
    return %c0_i32, %c0_i32_0 : i32, i32
  }
  func.func @transform_10(%arg0: i32) -> (i32, i32) {
    %c0_i32 = arith.constant 0 : i32
    %c0_i32_0 = arith.constant 0 : i32
    %c0_i32_1 = arith.constant 0 : i32
    return %c0_i32, %c0_i32_0 : i32, i32
  }
  func.func @transform_11(%arg0: i32) -> (i32, i32) {
    %c0_i32 = arith.constant 0 : i32
    %c0_i32_0 = arith.constant 0 : i32
    return %arg0, %c0_i32 : i32, i32
  }
}

</mosaic_0001>

<bundles_post_ra>
// kernel: value_net_forward.1
= control target key start
LH: loop header
LB: loop body
LE: loop exit
PB: predicated region body
PF: predicated region fallthrough
CT: control target
= control target key end

     0   :  { %s1349_s0 = inlined_call_operand.vmem [shape: f32[2,32], index: 0, kind: input, shape index: {}]   ;;  %s1350_s1 = inlined_call_operand.vmem [shape: f32[32,256], index: 1, kind: input, shape index: {}]   ;;  %s1351_s2 = inlined_call_operand.vmem [shape: f32[1,256], index: 2, kind: input, shape index: {}]   ;;  %s1352_s3 = inlined_call_operand.hbm [shape: f32[256,256], index: 3, kind: input, shape index: {}]   ;;  %s1353_s4 = inlined_call_operand.vmem [shape: f32[1,256], index: 4, kind: input, shape index: {}]   ;;  %s1354_s5 = inlined_call_operand.hbm [shape: f32[256,512], index: 5, kind: input, shape index: {}]   ;;  %s1355_s6 = inlined_call_operand.vmem [shape: f32[1,512], index: 6, kind: input, shape index: {}]   ;;  %s1356_s7 = inlined_call_operand.vmem [shape: f32[128,64], index: 7, kind: input, shape index: {}]   ;;  %s1357_s8 = inlined_call_operand.vmem [shape: f32[1,64], index: 8, kind: input, shape index: {}]   ;;  %s1358_s9 = inlined_call_operand.vmem [shape: f32[1,64], index: 9, kind: input, shape index: {}]   ;;  %s1359_s10 = inlined_call_operand.<no memory space> [shape: f32[1,1], index: 10, kind: input, shape index: {}]   ;;  %s1360_s11 = inlined_call_operand.vmem [shape: f32[2,1], index: 11, kind: output, shape index: {}]  }
   0x1   :  { %v16_v0 = vstv %s1359_s10 }
   0x2   :  { %17 = vst [vmem:[#allocation2] sm:$0x1] %v16_v0 }
   0x3   :  { %18 = vsyncpa [#allocation4], 0  ;;  %s30_s21 = sshll.u32 %s1352_s3, 4  ;;  %s31_s21 = int_to_ptr.hbm [resolvable:$true] %s30_s21 }
   0x4   :  { %19 = vsyncpa [#allocation6], 0  ;;  %s1059_s22 = smov [#allocation3]   ;;  %s45_s26 = sshll.u32 %s1354_s5, 4  ;;  %s46_s26 = int_to_ptr.hbm [resolvable:$true] %s45_s26 }
   0x5   :  { %s32_s23 = sshll.u32 %s1059_s22, 4  ;;  %s1060_s27 = smov 256   ;;  %s33_s23 = int_to_ptr.vmem [resolvable:$true] %s32_s23 }
   0x6   :  { %s1061_s28 = smov 16   ;;  %s1062_s10 = smov [#allocation5]  }
   0x7   :  { %38 = dma.hbm_to_vmem [thread:$0]  %s31_s21, 8192, %s33_s23, [#allocation4], %s1060_s27, %s1060_s27, %s1061_s28  }
   0x8   :  { %s47_s29 = sshll.u32 %s1062_s10, 4  ;;  %s1063_s30 = smov 512   ;;  %s48_s29 = int_to_ptr.vmem [resolvable:$true] %s47_s29 }
   0x9   :  { %s1064_s12 = smov 32  }
   0xa   :  { %53 = dma.hbm_to_vmem [thread:$0]  %s46_s26, 16384, %s48_s29, [#allocation6], %s1063_s30, %s1063_s30, %s1064_s12  }
   0xb   :  { %1055 = dma.done.wait [#allocation4], 8192  }
   0xc   :  { %1056 = vsyncadd [#allocation4], 4294959104 }
   0xd   :  { %1057 = dma.done.wait [#allocation6], 16384  }
   0xe   :  { %1058 = vsyncadd [#allocation6], 4294950912  ;;  %v79_v1 = vld [vmem:[%s1350_s1 + $0x30] sm:$0xff]  ;;  %v80_v2 = vld [vmem:[%s1350_s1 + $0x38] sm:$0xff]  ;;  %vm87_vm0 = vcmask 261120   ;;  %vm906_vm1 = vcmask 523264  }
   0xf   :  { %v77_v3 = vld [vmem:[%s1350_s1 + $0x20] sm:$0xff]  ;;  %103 = vmatpush.msra.mxu0 %v79_v1  ;;  %123 = vmatpush.msra.mxu1 %v80_v2  ;;  %v78_v4 = vld [vmem:[%s1350_s1 + $0x28] sm:$0xff]  ;;  %v75_v5 = vld [vmem:[%s1350_s1 + $0x10] sm:$0xff]  ;;  %vm915_vm2 = vcmask 7168  }
  0x10   :  { %v76_v6 = vld [vmem:[%s1350_s1 + $0x18] sm:$0xff]  ;;  %v73_v7 = vld [vmem:[%s1350_s1] sm:$0xff]  ;;  %v74_v8 = vld [vmem:[%s1350_s1 + $0x8] sm:$0xff] }
  0x11   :  { %104 = vmatpush.msra.mxu0 %v77_v3  ;;  %124 = vmatpush.msra.mxu1 %v78_v4  ;;  %v72_v9 = vld [vmem:[%s1349_s0] sm:$0xff]  ;;  %v223_v10 = vld [vmem:[#allocation3 + $0xf0] sm:$0xff]  ;;  %v222_v16 = vld [vmem:[#allocation3 + $0xe8] sm:$0xff] }
  0x12   :  { %v255_v11 = vld [vmem:[#allocation3 + $0x1f0] sm:$0xff]  ;;  %v224_v12 = vld [vmem:[#allocation3 + $0xf8] sm:$0xff]  ;;  %263 = vmatpush.msra.mxu2 %v223_v10  ;;  %v221_v14 = vld [vmem:[#allocation3 + $0xe0] sm:$0xff] }
  0x13   :  { %105 = vmatpush.msra.mxu0 %v75_v5  ;;  %125 = vmatpush.msra.mxu1 %v76_v6  ;;  %v256_v13 = vld [vmem:[#allocation3 + $0x1f8] sm:$0xff]  ;;  %v253_v15 = vld [vmem:[#allocation3 + $0x1e0] sm:$0xff]  ;;  %v254_v18 = vld [vmem:[#allocation3 + $0x1e8] sm:$0xff] }
  0x14   :  { %283 = vmatpush.msra.mxu3 %v255_v11  ;;  %v81_v17 = vld [vmem:[%s1351_s2] sm:$0x3]  ;;  %264 = vmatpush.msra.mxu2 %v221_v14  ;;  %v219_v19 = vld [vmem:[#allocation3 + $0xd0] sm:$0xff]  ;;  %v218_v25 = vld [vmem:[#allocation3 + $0xc8] sm:$0xff] }
  0x15   :  { %106 = vmatpush.msra.mxu0 %v73_v7  ;;  %126 = vmatpush.msra.mxu1 %v74_v8  ;;  %v251_v20 = vld [vmem:[#allocation3 + $0x1d0] sm:$0xff]  ;;  %v220_v21 = vld [vmem:[#allocation3 + $0xd8] sm:$0xff]  ;;  %v217_v23 = vld [vmem:[#allocation3 + $0xc0] sm:$0xff]  ;;  %v83_v31 = vperm.slane %v81_v17, 0  ;;  %v84_v32 = vperm.slane %v81_v17, 1 }
  0x16   :  { %960 = vmatmul.msk.f32.vlgmr.msra.gmra.mxu0 %vm87_vm0, %v72_v9  ;;  %961 = vmatmul.msk.f32.vlgmr.msra.gmra.mxu1 %vm87_vm0, %v72_v9  ;;  %v252_v22 = vld [vmem:[#allocation3 + $0x1d8] sm:$0xff]  ;;  %v249_v24 = vld [vmem:[#allocation3 + $0x1c0] sm:$0xff]  ;;  %v250_v26 = vld [vmem:[#allocation3 + $0x1c8] sm:$0xff] }
  0x17   :  { %303 = vmatpush.msrb.mxu0 %v224_v12  ;;  %323 = vmatpush.msrb.mxu1 %v256_v13  ;;  %v215_v27 = vld [vmem:[#allocation3 + $0xb0] sm:$0xff]  ;;  %v216_v29 = vld [vmem:[#allocation3 + $0xb8] sm:$0xff]  ;;  %v213_v33 = vld [vmem:[#allocation3 + $0xa0] sm:$0xff] }
  0x18   :  { %284 = vmatpush.msra.mxu3 %v253_v15  ;;  %265 = vmatpush.msra.mxu2 %v219_v19  ;;  %v247_v28 = vld [vmem:[#allocation3 + $0x1b0] sm:$0xff]  ;;  %v248_v30 = vld [vmem:[#allocation3 + $0x1b8] sm:$0xff]  ;;  %v245_v34 = vld [vmem:[#allocation3 + $0x1a0] sm:$0xff] }
  0x19   :  { %304 = vmatpush.msrb.mxu0 %v222_v16  ;;  %324 = vmatpush.msrb.mxu1 %v254_v18  ;;  %v214_v35 = vld [vmem:[#allocation3 + $0xa8] sm:$0xff]  ;;  %v211_v37 = vld [vmem:[#allocation3 + $0x90] sm:$0xff]  ;;  %v212_v41 = vld [vmem:[#allocation3 + $0x98] sm:$0xff] }
  0x1a   :  { %285 = vmatpush.msra.mxu3 %v251_v20  ;;  %266 = vmatpush.msra.mxu2 %v217_v23  ;;  %v246_v36 = vld [vmem:[#allocation3 + $0x1a8] sm:$0xff]  ;;  %v243_v38 = vld [vmem:[#allocation3 + $0x190] sm:$0xff]  ;;  %v244_v42 = vld [vmem:[#allocation3 + $0x198] sm:$0xff] }
  0x1b   :  { %305 = vmatpush.msrb.mxu0 %v220_v21  ;;  %325 = vmatpush.msrb.mxu1 %v252_v22  ;;  %v209_v45 = vld [vmem:[#allocation3 + $0x80] sm:$0xff]  ;;  %v210_v47 = vld [vmem:[#allocation3 + $0x88] sm:$0xff]  ;;  %v207_v51 = vld [vmem:[#allocation3 + $0x70] sm:$0xff] }
  0x1c   :  { %286 = vmatpush.msra.mxu3 %v249_v24  ;;  %267 = vmatpush.msra.mxu2 %v215_v27  ;;  %v241_v46 = vld [vmem:[#allocation3 + $0x180] sm:$0xff]  ;;  %v242_v48 = vld [vmem:[#allocation3 + $0x188] sm:$0xff]  ;;  %v239_v52 = vld [vmem:[#allocation3 + $0x170] sm:$0xff] }
  0x1d   :  { %306 = vmatpush.msrb.mxu0 %v218_v25  ;;  %326 = vmatpush.msrb.mxu1 %v250_v26  ;;  %v208_v53 = vld [vmem:[#allocation3 + $0x78] sm:$0xff]  ;;  %v205_v57 = vld [vmem:[#allocation3 + $0x60] sm:$0xff]  ;;  %v206_v59 = vld [vmem:[#allocation3 + $0x68] sm:$0xff] }
  0x1e   :  { %287 = vmatpush.msra.mxu3 %v247_v28  ;;  %268 = vmatpush.msra.mxu2 %v213_v33  ;;  %v240_v54 = vld [vmem:[#allocation3 + $0x178] sm:$0xff]  ;;  %v237_v58 = vld [vmem:[#allocation3 + $0x160] sm:$0xff]  ;;  %v238_v60 = vld [vmem:[#allocation3 + $0x168] sm:$0xff] }
  0x1f   :  { %307 = vmatpush.msrb.mxu0 %v216_v29  ;;  %327 = vmatpush.msrb.mxu1 %v248_v30  ;;  %v203_v63 = vld [vmem:[#allocation3 + $0x50] sm:$0xff]  ;;  %v204_v1 = vld [vmem:[#allocation3 + $0x58] sm:$0xff]  ;;  %v201_v5 = vld [vmem:[#allocation3 + $0x40] sm:$0xff] }
  0x20   :  { %288 = vmatpush.msra.mxu3 %v245_v34  ;;  %269 = vmatpush.msra.mxu2 %v211_v37  ;;  %v235_v0 = vld [vmem:[#allocation3 + $0x150] sm:$0xff]  ;;  %v236_v2 = vld [vmem:[#allocation3 + $0x158] sm:$0xff]  ;;  %v233_v6 = vld [vmem:[#allocation3 + $0x140] sm:$0xff] }
  0x21   :  { %308 = vmatpush.msrb.mxu0 %v214_v35  ;;  %328 = vmatpush.msrb.mxu1 %v246_v36  ;;  %v202_v7 = vld [vmem:[#allocation3 + $0x48] sm:$0xff]  ;;  %v199_v9 = vld [vmem:[#allocation3 + $0x30] sm:$0xff]  ;;  %v200_v11 = vld [vmem:[#allocation3 + $0x38] sm:$0xff] }
  0x22   :  { %289 = vmatpush.msra.mxu3 %v243_v38  ;;  %270 = vmatpush.msra.mxu2 %v209_v45  ;;  %v234_v8 = vld [vmem:[#allocation3 + $0x148] sm:$0xff]  ;;  %v231_v10 = vld [vmem:[#allocation3 + $0x130] sm:$0xff]  ;;  %v232_v12 = vld [vmem:[#allocation3 + $0x138] sm:$0xff] }
  0x23   :  { %309 = vmatpush.msrb.mxu0 %v212_v41  ;;  %329 = vmatpush.msrb.mxu1 %v244_v42  ;;  %v197_v13 = vld [vmem:[#allocation3 + $0x20] sm:$0xff]  ;;  %v198_v15 = vld [vmem:[#allocation3 + $0x28] sm:$0xff]  ;;  %v195_v17 = vld [vmem:[#allocation3 + $0x10] sm:$0xff] }
  0x24   :  { %290 = vmatpush.msra.mxu3 %v241_v46  ;;  %271 = vmatpush.msra.mxu2 %v207_v51  ;;  %v229_v14 = vld [vmem:[#allocation3 + $0x120] sm:$0xff]  ;;  %v230_v16 = vld [vmem:[#allocation3 + $0x128] sm:$0xff]  ;;  %v227_v18 = vld [vmem:[#allocation3 + $0x110] sm:$0xff] }
  0x25   :  { %310 = vmatpush.msrb.mxu0 %v210_v47  ;;  %330 = vmatpush.msrb.mxu1 %v242_v48  ;;  %v196_v19 = vld [vmem:[#allocation3 + $0x18] sm:$0xff]  ;;  %v193_v22 = vld [vmem:[#allocation3] sm:$0xff]  ;;  %v194_v26 = vld [vmem:[#allocation3 + $0x8] sm:$0xff] }
  0x26   :  { %291 = vmatpush.msra.mxu3 %v239_v52  ;;  %272 = vmatpush.msra.mxu2 %v205_v57  ;;  %v228_v20 = vld [vmem:[#allocation3 + $0x118] sm:$0xff]  ;;  %v225_v23 = vld [vmem:[#allocation3 + $0x100] sm:$0xff]  ;;  %v226_v27 = vld [vmem:[#allocation3 + $0x108] sm:$0xff] }
  0x27   :  { %311 = vmatpush.msrb.mxu0 %v208_v53  ;;  %331 = vmatpush.msrb.mxu1 %v240_v54 }
  0x28   :  { %292 = vmatpush.msra.mxu3 %v237_v58  ;;  %273 = vmatpush.msra.mxu2 %v203_v63 }
  0x29   :  { %312 = vmatpush.msrb.mxu0 %v206_v59  ;;  %332 = vmatpush.msrb.mxu1 %v238_v60 }
  0x2a   :  { %293 = vmatpush.msra.mxu3 %v235_v0  ;;  %274 = vmatpush.msra.mxu2 %v201_v5 }
  0x2b   :  { %313 = vmatpush.msrb.mxu0 %v204_v1  ;;  %333 = vmatpush.msrb.mxu1 %v236_v2 }
  0x2c   :  { %294 = vmatpush.msra.mxu3 %v233_v6  ;;  %275 = vmatpush.msra.mxu2 %v199_v9 }
  0x2d   :  { %314 = vmatpush.msrb.mxu0 %v202_v7  ;;  %334 = vmatpush.msrb.mxu1 %v234_v8 }
  0x2e   :  { %295 = vmatpush.msra.mxu3 %v231_v10  ;;  %276 = vmatpush.msra.mxu2 %v197_v13  ;;  %v529_v13 = vld [vmem:[#allocation5 + $0x3e0] sm:$0xff] }
  0x2f   :  { %315 = vmatpush.msrb.mxu0 %v200_v11  ;;  %335 = vmatpush.msrb.mxu1 %v232_v12 }
  0x30   :  { %296 = vmatpush.msra.mxu3 %v229_v14  ;;  %277 = vmatpush.msra.mxu2 %v195_v17  ;;  %v526_v14 = vld [vmem:[#allocation5 + $0x3c8] sm:$0xff] }
  0x31   :  { %316 = vmatpush.msrb.mxu0 %v198_v15  ;;  %336 = vmatpush.msrb.mxu1 %v230_v16  ;;  %v521_v15 = vld [vmem:[#allocation5 + $0x3a0] sm:$0xff]  ;;  %v466_v17 = vld [vmem:[#allocation5 + $0x1e8] sm:$0xff] }
  0x32   :  { %297 = vmatpush.msra.mxu3 %v227_v18  ;;  %278 = vmatpush.msra.mxu2 %v193_v22  ;;  %v517_v16 = vld [vmem:[#allocation5 + $0x380] sm:$0xff]  ;;  %v518_v18 = vld [vmem:[#allocation5 + $0x388] sm:$0xff] }
  0x33   :  { %317 = vmatpush.msrb.mxu0 %v196_v19  ;;  %337 = vmatpush.msrb.mxu1 %v228_v20  ;;  %v461_v19 = vld [vmem:[#allocation5 + $0x1c0] sm:$0xff]  ;;  %v514_v22 = vld [vmem:[#allocation5 + $0x368] sm:$0xff] }
  0x34   :  { %298 = vmatpush.msra.mxu3 %v225_v23  ;;  %v513_v20 = vld [vmem:[#allocation5 + $0x360] sm:$0xff] }
  0x35   :  { %318 = vmatpush.msrb.mxu0 %v194_v26  ;;  %338 = vmatpush.msrb.mxu1 %v226_v27  ;;  %v457_v23 = vld [vmem:[#allocation5 + $0x1a0] sm:$0xff]  ;;  %v510_v26 = vld [vmem:[#allocation5 + $0x348] sm:$0xff] }
  0x36   :  { %563 = vmatpush.msrb.mxu3 %v529_v13  ;;  %v453_v27 = vld [vmem:[#allocation5 + $0x180] sm:$0xff]  ;;  %v414_v13 = vld [vmem:[#allocation5 + $0x48] sm:$0xff] }
  0x37   :  { %583 = vmatpush.msra.mxu0 %v466_v17 }
  0x93   :  { %v108_v39 = vpop.f32.mrf.mxu0  ;;  %v128_v40 = vpop.f32.mrf.mxu1 }
  0x94   :  { %v1164_v43 = vadd.f32 %v108_v39, %v83_v31  ;;  %v1166_v44 = vadd.f32 %v128_v40, %v84_v32 }
  0x96   :  { %v1169_v49 = vmul.f32 0.70710677, %v1164_v43  ;;  %v1172_v50 = vmul.f32 0.70710677, %v1166_v44  ;;  %v131_v7 = vmul.f32 0.5, %v1164_v43  ;;  %v132_v9 = vmul.f32 0.5, %v1166_v44 }
  0x97   :  { %v522_v43 = vld [vmem:[#allocation5 + $0x3a8] sm:$0xff]  ;;  %v465_v44 = vld [vmem:[#allocation5 + $0x1e0] sm:$0xff] }
  0x98   :  { %v1175_v55 = vand.u32 2147483647, %v1169_v49  ;;  %v1178_v56 = vand.u32 2147483647, %v1172_v50  ;;  %v181_v1 = vand.u32 2147483648, %v1169_v49  ;;  %v530_v49 = vld [vmem:[#allocation5 + $0x3e8] sm:$0xff]  ;;  %543 = vmatpush.msrb.mxu2 %v465_v44 }
  0x99   :  { %603 = vmatpush.msra.mxu1 %v530_v49  ;;  %v410_v44 = vld [vmem:[#allocation5 + $0x28] sm:$0xff] }
  0x9a   :  { %v137_v61 = vmul.f32 0.3275911, %v1175_v55  ;;  %v138_v62 = vmul.f32 0.3275911, %v1178_v56  ;;  %v167_v32 = vsub.f32 0.0, %v1175_v55  ;;  %v168_v34 = vsub.f32 0.0, %v1178_v56  ;;  %544 = vmatpush.msrb.mxu2 %v461_v19 }
  0x9b   :  { %604 = vmatpush.msra.mxu1 %v526_v14  ;;  %v528_v14 = vld [vmem:[#allocation5 + $0x3d8] sm:$0xff] }
  0x9c   :  { %v139_v3 = vadd.f32 1.0, %v137_v61  ;;  %v140_v4 = vadd.f32 1.0, %v138_v62  ;;  %v169_v38 = vmul.f32 %v167_v32, %v1175_v55  ;;  %v170_v40 = vmul.f32 %v168_v34, %v1178_v56  ;;  %545 = vmatpush.msrb.mxu2 %v457_v23  ;;  %v501_v32 = vld [vmem:[#allocation5 + $0x300] sm:$0xff]  ;;  %v502_v34 = vld [vmem:[#allocation5 + $0x308] sm:$0xff]  ;;  %v524_v19 = vld [vmem:[#allocation5 + $0x3b8] sm:$0xff] }
  0x9d   :  { %605 = vmatpush.msra.mxu1 %v522_v43  ;;  %v409_v43 = vld [vmem:[#allocation5 + $0x20] sm:$0xff]  ;;  %v467_v23 = vld [vmem:[#allocation5 + $0x1f0] sm:$0xff] }
  0x9e   :  { %971 = vrcp.f32 %v139_v3  ;;  %v171_v46 = vmul.f32 1.442695, %v169_v38  ;;  %v173_v48 = vmul.f32 1.442695, %v170_v40  ;;  %546 = vmatpush.msrb.mxu2 %v453_v27  ;;  %v498_v38 = vld [vmem:[#allocation5 + $0x2e8] sm:$0xff]  ;;  %v493_v40 = vld [vmem:[#allocation5 + $0x2c0] sm:$0xff] }
  0x9f   :  { %973 = vrcp.f32 %v140_v4  ;;  %606 = vmatpush.msra.mxu1 %v518_v18  ;;  %v523_v18 = vld [vmem:[#allocation5 + $0x3b0] sm:$0xff]  ;;  %v520_v27 = vld [vmem:[#allocation5 + $0x398] sm:$0xff] }
  0xa0   :  { %975 = vpow2.f32 %v171_v46  ;;  %v489_v46 = vld [vmem:[#allocation5 + $0x2a0] sm:$0xff] }
  0xa1   :  { %977 = vpow2.f32 %v173_v48  ;;  %607 = vmatpush.msra.mxu1 %v514_v22  ;;  %v490_v48 = vld [vmem:[#allocation5 + $0x2a8] sm:$0xff] }
  0xa3   :  { %608 = vmatpush.msra.mxu1 %v510_v26 }
  0xa4   :  { %v972_v21 = vpop.eup %971 }
  0xa5   :  { %v974_v24 = vpop.eup %973  ;;  %v143_v25 = vmul.f32 %v972_v21, %v139_v3  ;;  %v182_v3 = vand.u32 2147483648, %v1172_v50  ;;  %v525_v50 = vld [vmem:[#allocation5 + $0x3c0] sm:$0xff] }
  0xa6   :  { %v144_v28 = vmul.f32 %v974_v24, %v140_v4  ;;  %v976_v61 = vpop.eup %975  ;;  %564 = vmatpush.msrb.mxu3 %v525_v50  ;;  %v527_v50 = vld [vmem:[#allocation5 + $0x3d0] sm:$0xff] }
  0xa7   :  { %v145_v29 = vsub.f32 2.0, %v143_v25  ;;  %v978_v56 = vpop.eup %977  ;;  %v458_v25 = vld [vmem:[#allocation5 + $0x1a8] sm:$0xff] }
  0xa8   :  { %v146_v30 = vsub.f32 2.0, %v144_v28  ;;  %565 = vmatpush.msrb.mxu3 %v521_v15  ;;  %v505_v28 = vld [vmem:[#allocation5 + $0x320] sm:$0xff] }
  0xa9   :  { %v147_v31 = vmul.f32 %v972_v21, %v145_v29  ;;  %v462_v21 = vld [vmem:[#allocation5 + $0x1c8] sm:$0xff] }
  0xaa   :  { %v148_v33 = vmul.f32 %v974_v24, %v146_v30  ;;  %566 = vmatpush.msrb.mxu3 %v517_v16  ;;  %584 = vmatpush.msra.mxu0 %v462_v21  ;;  %v509_v24 = vld [vmem:[#allocation5 + $0x340] sm:$0xff]  ;;  %v454_v29 = vld [vmem:[#allocation5 + $0x188] sm:$0xff] }
  0xab   :  { %v149_v35 = vmul.f32 1.0614054, %v147_v31  ;;  %v506_v30 = vld [vmem:[#allocation5 + $0x328] sm:$0xff] }
  0xac   :  { %v150_v36 = vmul.f32 1.0614054, %v148_v33  ;;  %567 = vmatpush.msrb.mxu3 %v513_v20  ;;  %585 = vmatpush.msra.mxu0 %v458_v25  ;;  %v405_v20 = vld [vmem:[#allocation5] sm:$0xff]  ;;  %v406_v21 = vld [vmem:[#allocation5 + $0x8] sm:$0xff]  ;;  %v468_v25 = vld [vmem:[#allocation5 + $0x1f8] sm:$0xff] }
  0xad   :  { %v151_v37 = vadd.f32 -1.4531521, %v149_v35  ;;  %609 = vmatpush.msra.mxu1 %v506_v30  ;;  %v445_v35 = vld [vmem:[#allocation5 + $0x140] sm:$0xff]  ;;  %v463_v30 = vld [vmem:[#allocation5 + $0x1d0] sm:$0xff] }
  0xae   :  { %v152_v39 = vadd.f32 -1.4531521, %v150_v36  ;;  %568 = vmatpush.msrb.mxu3 %v509_v24  ;;  %586 = vmatpush.msra.mxu0 %v454_v29  ;;  %v497_v36 = vld [vmem:[#allocation5 + $0x2e0] sm:$0xff]  ;;  %v519_v24 = vld [vmem:[#allocation5 + $0x390] sm:$0xff] }
  0xaf   :  { %v153_v41 = vmul.f32 %v151_v37, %v147_v31  ;;  %610 = vmatpush.msra.mxu1 %v502_v34  ;;  %v446_v37 = vld [vmem:[#allocation5 + $0x148] sm:$0xff]  ;;  %v516_v34 = vld [vmem:[#allocation5 + $0x378] sm:$0xff] }
  0xb0   :  { %v154_v42 = vmul.f32 %v152_v39, %v148_v33  ;;  %569 = vmatpush.msrb.mxu3 %v505_v28  ;;  %v441_v39 = vld [vmem:[#allocation5 + $0x120] sm:$0xff] }
  0xb1   :  { %v155_v45 = vadd.f32 1.4214138, %v153_v41  ;;  %611 = vmatpush.msra.mxu1 %v498_v38  ;;  %v442_v41 = vld [vmem:[#allocation5 + $0x128] sm:$0xff]  ;;  %v511_v38 = vld [vmem:[#allocation5 + $0x350] sm:$0xff] }
  0xb2   :  { %v156_v47 = vadd.f32 1.4214138, %v154_v42  ;;  %570 = vmatpush.msrb.mxu3 %v501_v32  ;;  %v494_v42 = vld [vmem:[#allocation5 + $0x2c8] sm:$0xff]  ;;  %v464_v32 = vld [vmem:[#allocation5 + $0x1d8] sm:$0xff] }
  0xb3   :  { %v157_v51 = vmul.f32 %v155_v45, %v147_v31  ;;  %612 = vmatpush.msra.mxu1 %v494_v42  ;;  %v437_v45 = vld [vmem:[#allocation5 + $0x100] sm:$0xff] }
  0xb4   :  { %v158_v52 = vmul.f32 %v156_v47, %v148_v33  ;;  %571 = vmatpush.msrb.mxu3 %v497_v36  ;;  %v438_v47 = vld [vmem:[#allocation5 + $0x108] sm:$0xff] }
  0xb5   :  { %v159_v53 = vadd.f32 -0.28449672, %v157_v51  ;;  %613 = vmatpush.msra.mxu1 %v490_v48  ;;  %v433_v51 = vld [vmem:[#allocation5 + $0xe0] sm:$0xff]  ;;  %v508_v48 = vld [vmem:[#allocation5 + $0x338] sm:$0xff] }
  0xb6   :  { %v160_v54 = vadd.f32 -0.28449672, %v158_v52  ;;  %572 = vmatpush.msrb.mxu3 %v493_v40  ;;  %v485_v52 = vld [vmem:[#allocation5 + $0x280] sm:$0xff]  ;;  %v512_v40 = vld [vmem:[#allocation5 + $0x358] sm:$0xff] }
  0xb7   :  { %v161_v57 = vmul.f32 %v159_v53, %v147_v31  ;;  %v434_v53 = vld [vmem:[#allocation5 + $0xe8] sm:$0xff] }
  0xb8   :  { %v162_v58 = vmul.f32 %v160_v54, %v148_v33  ;;  %573 = vmatpush.msrb.mxu3 %v489_v46  ;;  %v486_v54 = vld [vmem:[#allocation5 + $0x288] sm:$0xff]  ;;  %v507_v46 = vld [vmem:[#allocation5 + $0x330] sm:$0xff] }
  0xb9   :  { %v163_v59 = vadd.f32 0.2548296, %v161_v57  ;;  %614 = vmatpush.msra.mxu1 %v486_v54  ;;  %v429_v57 = vld [vmem:[#allocation5 + $0xc0] sm:$0xff]  ;;  %v452_v54 = vld [vmem:[#allocation5 + $0x178] sm:$0xff] }
  0xba   :  { %v164_v60 = vadd.f32 0.2548296, %v162_v58  ;;  %574 = vmatpush.msrb.mxu3 %v485_v52  ;;  %v481_v58 = vld [vmem:[#allocation5 + $0x260] sm:$0xff]  ;;  %v451_v52 = vld [vmem:[#allocation5 + $0x170] sm:$0xff] }
  0xbb   :  { %v165_v55 = vmul.f32 %v163_v59, %v147_v31  ;;  %v449_v31 = vld [vmem:[#allocation5 + $0x160] sm:$0xff]  ;;  %v430_v59 = vld [vmem:[#allocation5 + $0xc8] sm:$0xff] }
  0xbc   :  { %v166_v62 = vmul.f32 %v164_v60, %v148_v33  ;;  %v450_v33 = vld [vmem:[#allocation5 + $0x168] sm:$0xff]  ;;  %547 = vmatpush.msrb.mxu2 %v449_v31  ;;  %v1193_v60 = vld [vmem:[%s1353_s4] sm:$0x3]  ;;  %575 = vmatpush.msrb.mxu3 %v481_v58  ;;  %v515_v31 = vld [vmem:[#allocation5 + $0x370] sm:$0xff] }
  0xbd   :  { %v175_v63 = vmul.f32 %v976_v61, %v165_v55  ;;  %587 = vmatpush.msra.mxu0 %v450_v33  ;;  %v482_v55 = vld [vmem:[#allocation5 + $0x268] sm:$0xff]  ;;  %v425_v61 = vld [vmem:[#allocation5 + $0xa0] sm:$0xff]  ;;  %v259_v17 = vperm.slane %v1193_v60, 0 }
  0xbe   :  { %v176_v0 = vmul.f32 %v978_v56, %v166_v62  ;;  %548 = vmatpush.msrb.mxu2 %v445_v35  ;;  %615 = vmatpush.msra.mxu1 %v482_v55  ;;  %v477_v62 = vld [vmem:[#allocation5 + $0x240] sm:$0xff]  ;;  %v426_v56 = vld [vmem:[#allocation5 + $0xa8] sm:$0xff]  ;;  %v448_v55 = vld [vmem:[#allocation5 + $0x158] sm:$0xff] }
  0xbf   :  { %v177_v2 = vsub.f32 1.0, %v175_v63  ;;  %588 = vmatpush.msra.mxu0 %v446_v37  ;;  %576 = vmatpush.msrb.mxu3 %v477_v62  ;;  %v478_v63 = vld [vmem:[#allocation5 + $0x248] sm:$0xff]  ;;  %v459_v37 = vld [vmem:[#allocation5 + $0x1b0] sm:$0xff] }
  0xc0   :  { %v178_v4 = vsub.f32 1.0, %v176_v0  ;;  %549 = vmatpush.msrb.mxu2 %v441_v39  ;;  %616 = vmatpush.msra.mxu1 %v478_v63  ;;  %v421_v0 = vld [vmem:[#allocation5 + $0x80] sm:$0xff]  ;;  %v460_v39 = vld [vmem:[#allocation5 + $0x1b8] sm:$0xff]  ;;  %v495_v63 = vld [vmem:[#allocation5 + $0x2d0] sm:$0xff] }
  0xc1   :  { %v185_v5 = vor.u32 %v181_v1, %v177_v2  ;;  %589 = vmatpush.msra.mxu0 %v442_v41  ;;  %v473_v1 = vld [vmem:[#allocation5 + $0x220] sm:$0xff]  ;;  %v422_v2 = vld [vmem:[#allocation5 + $0x88] sm:$0xff] }
  0xc2   :  { %v186_v6 = vor.u32 %v182_v3, %v178_v4  ;;  %550 = vmatpush.msrb.mxu2 %v437_v45  ;;  %v260_v3 = vperm.slane %v1193_v60, 1  ;;  %577 = vmatpush.msrb.mxu3 %v473_v1  ;;  %v474_v4 = vld [vmem:[#allocation5 + $0x228] sm:$0xff]  ;;  %v455_v45 = vld [vmem:[#allocation5 + $0x190] sm:$0xff]  ;;  %v496_v1 = vld [vmem:[#allocation5 + $0x2d8] sm:$0xff] }
  0xc3   :  { %v189_v8 = vadd.f32 1.0, %v185_v5  ;;  %590 = vmatpush.msra.mxu0 %v438_v47  ;;  %617 = vmatpush.msra.mxu1 %v474_v4  ;;  %v417_v5 = vld [vmem:[#allocation5 + $0x60] sm:$0xff]  ;;  %v456_v47 = vld [vmem:[#allocation5 + $0x198] sm:$0xff]  ;;  %v499_v60 = vld [vmem:[#allocation5 + $0x2f0] sm:$0xff] }
  0xc4   :  { %v190_v10 = vadd.f32 1.0, %v186_v6  ;;  %551 = vmatpush.msrb.mxu2 %v433_v51  ;;  %v469_v6 = vld [vmem:[#allocation5 + $0x200] sm:$0xff]  ;;  %v491_v4 = vld [vmem:[#allocation5 + $0x2b0] sm:$0xff] }
  0xc5   :  { %v191_v11 = vmul.f32 %v189_v8, %v131_v7  ;;  %591 = vmatpush.msra.mxu0 %v434_v53  ;;  %v418_v7 = vld [vmem:[#allocation5 + $0x68] sm:$0xff]  ;;  %578 = vmatpush.msrb.mxu3 %v469_v6  ;;  %v503_v53 = vld [vmem:[#allocation5 + $0x310] sm:$0xff] }
  0xc6   :  { %v192_v12 = vmul.f32 %v190_v10, %v132_v9  ;;  %552 = vmatpush.msrb.mxu2 %v429_v57  ;;  %v470_v8 = vld [vmem:[#allocation5 + $0x208] sm:$0xff]  ;;  %v531_v9 = vld [vmem:[#allocation5 + $0x3f0] sm:$0xff]  ;;  %v532_v10 = vld [vmem:[#allocation5 + $0x3f8] sm:$0xff] }
  0xc7   :  { %279 = vmatmul.f32.vlgmr.msra.gmra.mxu2 %v191_v11  ;;  %319 = vmatmul.f32.vlgmr.msrb.gmra.mxu0 %v191_v11  ;;  %v504_v57 = vld [vmem:[#allocation5 + $0x318] sm:$0xff] }
  0xc8   :  { %299 = vmatmul.f32.vlgmr.msra.gmra.mxu3 %v192_v12  ;;  %339 = vmatmul.f32.vlgmr.msrb.gmra.mxu1 %v192_v12  ;;  %v413_v12 = vld [vmem:[#allocation5 + $0x40] sm:$0xff] }
  0xc9   :  { %592 = vmatpush.msra.mxu0 %v430_v59  ;;  %553 = vmatpush.msrb.mxu2 %v425_v61  ;;  %v447_v59 = vld [vmem:[#allocation5 + $0x150] sm:$0xff]  ;;  %v500_v61 = vld [vmem:[#allocation5 + $0x2f8] sm:$0xff] }
  0xca   :  { %618 = vmatpush.msra.mxu1 %v470_v8  ;;  %643 = vmatpush.msra.mxu3 %v531_v9  ;;  %v435_v8 = vld [vmem:[#allocation5 + $0xf0] sm:$0xff] }
  0xcb   :  { %593 = vmatpush.msra.mxu0 %v426_v56  ;;  %554 = vmatpush.msrb.mxu2 %v421_v0  ;;  %v443_v56 = vld [vmem:[#allocation5 + $0x130] sm:$0xff]  ;;  %v444_v0 = vld [vmem:[#allocation5 + $0x138] sm:$0xff] }
  0xcc   :  { %683 = vmatpush.msrb.mxu1 %v532_v10  ;;  %644 = vmatpush.msra.mxu3 %v527_v50  ;;  %v487_v9 = vld [vmem:[#allocation5 + $0x290] sm:$0xff]  ;;  %v436_v10 = vld [vmem:[#allocation5 + $0xf8] sm:$0xff] }
  0xcd   :  { %594 = vmatpush.msra.mxu0 %v422_v2  ;;  %555 = vmatpush.msrb.mxu2 %v417_v5  ;;  %v440_v5 = vld [vmem:[#allocation5 + $0x118] sm:$0xff] }
  0xce   :  { %684 = vmatpush.msrb.mxu1 %v528_v14  ;;  %645 = vmatpush.msra.mxu3 %v523_v18  ;;  %v432_v50 = vld [vmem:[#allocation5 + $0xd8] sm:$0xff]  ;;  %v479_v18 = vld [vmem:[#allocation5 + $0x250] sm:$0xff] }
  0xcf   :  { %595 = vmatpush.msra.mxu0 %v418_v7  ;;  %556 = vmatpush.msrb.mxu2 %v413_v12  ;;  %v492_v7 = vld [vmem:[#allocation5 + $0x2b8] sm:$0xff] }
  0xd0   :  { %685 = vmatpush.msrb.mxu1 %v524_v19  ;;  %646 = vmatpush.msra.mxu3 %v519_v24  ;;  %v488_v12 = vld [vmem:[#allocation5 + $0x298] sm:$0xff]  ;;  %v423_v24 = vld [vmem:[#allocation5 + $0x90] sm:$0xff] }
  0xd1   :  { %596 = vmatpush.msra.mxu0 %v414_v13  ;;  %557 = vmatpush.msrb.mxu2 %v409_v43  ;;  %v431_v13 = vld [vmem:[#allocation5 + $0xd0] sm:$0xff]  ;;  %v428_v19 = vld [vmem:[#allocation5 + $0xb8] sm:$0xff] }
  0xd2   :  { %686 = vmatpush.msrb.mxu1 %v520_v27  ;;  %647 = vmatpush.msra.mxu3 %v515_v31  ;;  %v476_v27 = vld [vmem:[#allocation5 + $0x238] sm:$0xff]  ;;  %v419_v31 = vld [vmem:[#allocation5 + $0x70] sm:$0xff] }
  0xd3   :  { %597 = vmatpush.msra.mxu0 %v410_v44  ;;  %558 = vmatpush.msrb.mxu2 %v405_v20 }
  0xd4   :  { %687 = vmatpush.msrb.mxu1 %v516_v34  ;;  %648 = vmatpush.msra.mxu3 %v511_v38  ;;  %v420_v34 = vld [vmem:[#allocation5 + $0x78] sm:$0xff] }
  0xd5   :  { %598 = vmatpush.msra.mxu0 %v406_v21  ;;  %623 = vmatpush.msra.mxu2 %v467_v23  ;;  %v480_v23 = vld [vmem:[#allocation5 + $0x258] sm:$0xff] }
  0xd6   :  { %688 = vmatpush.msrb.mxu1 %v512_v40  ;;  %649 = vmatpush.msra.mxu3 %v507_v46 }
  0xd7   :  { %663 = vmatpush.msrb.mxu0 %v468_v25  ;;  %624 = vmatpush.msra.mxu2 %v463_v30  ;;  %v475_v25 = vld [vmem:[#allocation5 + $0x230] sm:$0xff] }
  0xd8   :  { %689 = vmatpush.msrb.mxu1 %v508_v48  ;;  %650 = vmatpush.msra.mxu3 %v503_v53  ;;  %v412_v48 = vld [vmem:[#allocation5 + $0x38] sm:$0xff] }
  0xd9   :  { %664 = vmatpush.msrb.mxu0 %v464_v32  ;;  %625 = vmatpush.msra.mxu2 %v459_v37  ;;  %v471_v32 = vld [vmem:[#allocation5 + $0x210] sm:$0xff] }
  0xda   :  { %690 = vmatpush.msrb.mxu1 %v504_v57  ;;  %651 = vmatpush.msra.mxu3 %v499_v60 }
  0xdb   :  { %665 = vmatpush.msrb.mxu0 %v460_v39  ;;  %626 = vmatpush.msra.mxu2 %v455_v45  ;;  %v415_v39 = vld [vmem:[#allocation5 + $0x50] sm:$0xff] }
  0xdc   :  { %691 = vmatpush.msrb.mxu1 %v500_v61  ;;  %652 = vmatpush.msra.mxu3 %v495_v63 }
  0xdd   :  { %666 = vmatpush.msrb.mxu0 %v456_v47  ;;  %627 = vmatpush.msra.mxu2 %v451_v52 }
  0xde   :  { %692 = vmatpush.msrb.mxu1 %v496_v1  ;;  %653 = vmatpush.msra.mxu3 %v491_v4 }
  0xdf   :  { %667 = vmatpush.msrb.mxu0 %v452_v54  ;;  %628 = vmatpush.msra.mxu2 %v447_v59  ;;  %v407_v54 = vld [vmem:[#allocation5 + $0x10] sm:$0xff] }
  0xe0   :  { %693 = vmatpush.msrb.mxu1 %v492_v7  ;;  %654 = vmatpush.msra.mxu3 %v487_v9 }
  0xe1   :  { %668 = vmatpush.msrb.mxu0 %v448_v55  ;;  %629 = vmatpush.msra.mxu2 %v443_v56 }
  0xe2   :  { %694 = vmatpush.msrb.mxu1 %v488_v12 }
  0xe3   :  { %669 = vmatpush.msrb.mxu0 %v444_v0 }
  0xe5   :  { %670 = vmatpush.msrb.mxu0 %v440_v5 }
  0xe7   :  { %671 = vmatpush.msrb.mxu0 %v436_v10 }
  0xe9   :  { %672 = vmatpush.msrb.mxu0 %v432_v50 }
  0xeb   :  { %673 = vmatpush.msrb.mxu0 %v428_v19 }
 0x144   :  { %v320_v11 = vpop.f32.mrf.mxu0 }
 0x145   :  { %v321_v49 = vadd.f32 %v320_v11, %v260_v3  ;;  %v340_v15 = vpop.f32.mrf.mxu1  ;;  %v439_v3 = vld [vmem:[#allocation5 + $0x110] sm:$0xff] }
 0x146   :  { %630 = vmatpush.msra.mxu2 %v439_v3 }
 0x147   :  { %v1196_v16 = vadd.f32 %v340_v15, %v321_v49  ;;  %v483_v49 = vld [vmem:[#allocation5 + $0x270] sm:$0xff]  ;;  %v484_v15 = vld [vmem:[#allocation5 + $0x278] sm:$0xff] }
 0x148   :  { %631 = vmatpush.msra.mxu2 %v435_v8  ;;  %655 = vmatpush.msra.mxu3 %v483_v49 }
 0x149   :  { %v1200_v22 = vmul.f32 0.70710677, %v1196_v16  ;;  %695 = vmatpush.msrb.mxu1 %v484_v15  ;;  %v344_v10 = vmul.f32 0.5, %v1196_v16  ;;  %v533_v16 = vld [vmem:[%s1355_s6] sm:$0xf] }
 0x14a   :  { %v280_v26 = vpop.f32.mrf.mxu2  ;;  %632 = vmatpush.msra.mxu2 %v431_v13  ;;  %656 = vmatpush.msra.mxu3 %v479_v18 }
 0x14b   :  { %v1203_v28 = vand.u32 2147483647, %v1200_v22  ;;  %v281_v29 = vadd.f32 %v280_v26, %v259_v17  ;;  %v300_v33 = vpop.f32.mrf.mxu3  ;;  %v427_v17 = vld [vmem:[#allocation5 + $0xb0] sm:$0xff]  ;;  %v424_v26 = vld [vmem:[#allocation5 + $0x98] sm:$0xff]  ;;  %696 = vmatpush.msrb.mxu1 %v480_v23  ;;  %v394_v5 = vand.u32 2147483648, %v1200_v22  ;;  %v536_v22 = vperm.slane %v533_v16, 1 }
 0x14c   :  { %633 = vmatpush.msra.mxu2 %v427_v17  ;;  %657 = vmatpush.msra.mxu3 %v475_v25 }
 0x14d   :  { %v350_v35 = vmul.f32 0.3275911, %v1203_v28  ;;  %v1206_v36 = vadd.f32 %v300_v33, %v281_v29  ;;  %v380_v44 = vsub.f32 0.0, %v1203_v28  ;;  %674 = vmatpush.msrb.mxu0 %v424_v26  ;;  %697 = vmatpush.msrb.mxu1 %v476_v27 }
 0x14e   :  { %634 = vmatpush.msra.mxu2 %v423_v24  ;;  %658 = vmatpush.msra.mxu3 %v471_v32  ;;  %v845_v32 = vld [vmem:[%s1356_s7 + $0x78] sm:$0xff] }
 0x14f   :  { %v352_v41 = vadd.f32 1.0, %v350_v35  ;;  %v1209_v42 = vmul.f32 0.70710677, %v1206_v36  ;;  %v382_v33 = vmul.f32 %v380_v44, %v1203_v28  ;;  %v472_v35 = vld [vmem:[#allocation5 + $0x218] sm:$0xff]  ;;  %675 = vmatpush.msrb.mxu0 %v420_v34  ;;  %v411_v28 = vld [vmem:[#allocation5 + $0x30] sm:$0xff]  ;;  %v343_v15 = vmul.f32 0.5, %v1206_v36 }
 0x150   :  { %635 = vmatpush.msra.mxu2 %v419_v31  ;;  %698 = vmatpush.msrb.mxu1 %v472_v35 }
 0x151   :  { %979 = vrcp.f32 %v352_v41  ;;  %v1212_v51 = vand.u32 2147483647, %v1209_v42  ;;  %v385_v47 = vmul.f32 1.442695, %v382_v33  ;;  %v393_v50 = vand.u32 2147483648, %v1209_v42 }
 0x152   :  { %636 = vmatpush.msra.mxu2 %v415_v39 }
 0x153   :  { %v349_v58 = vmul.f32 0.3275911, %v1212_v51  ;;  %v379_v40 = vsub.f32 0.0, %v1212_v51 }
 0x154   :  { %637 = vmatpush.msra.mxu2 %v411_v28 }
 0x155   :  { %v351_v62 = vadd.f32 1.0, %v349_v58  ;;  %v381_v57 = vmul.f32 %v379_v40, %v1212_v51  ;;  %v408_v58 = vld [vmem:[#allocation5 + $0x18] sm:$0xff] }
 0x156   :  { %638 = vmatpush.msra.mxu2 %v407_v54 }
 0x157   :  { %v980_v2 = vpop.eup %979  ;;  %981 = vrcp.f32 %v351_v62 }
 0x158   :  { %v356_v6 = vmul.f32 %v980_v2, %v352_v41  ;;  %v416_v41 = vld [vmem:[#allocation5 + $0x58] sm:$0xff]  ;;  %983 = vpow2.f32 %v385_v47 }
 0x159   :  { %676 = vmatpush.msrb.mxu0 %v416_v41  ;;  %v843_v41 = vld [vmem:[%s1356_s7 + $0x68] sm:$0xff] }
 0x15a   :  { %v358_v11 = vsub.f32 2.0, %v356_v6 }
 0x15b   :  { %677 = vmatpush.msrb.mxu0 %v412_v48  ;;  %v842_v48 = vld [vmem:[%s1356_s7 + $0x60] sm:$0xff] }
 0x15c   :  { %v1215_v14 = vmul.f32 %v980_v2, %v358_v11 }
 0x15d   :  { %v982_v43 = vpop.eup %981  ;;  %678 = vmatpush.msrb.mxu0 %v408_v58  ;;  %v841_v58 = vld [vmem:[%s1356_s7 + $0x58] sm:$0xff] }
 0x15e   :  { %v362_v20 = vmul.f32 1.0614054, %v1215_v14  ;;  %v355_v21 = vmul.f32 %v982_v43, %v351_v62  ;;  %v383_v62 = vmul.f32 1.442695, %v381_v57  ;;  %v984_v2 = vpop.eup %983 }
 0x160   :  { %v364_v29 = vadd.f32 -1.4531521, %v362_v20  ;;  %v357_v30 = vsub.f32 2.0, %v355_v21  ;;  %985 = vpow2.f32 %v383_v62  ;;  %v535_v20 = vperm.slane %v533_v16, 0 }
 0x161   :  { %v538_v21 = vperm.slane %v533_v16, 3 }
 0x162   :  { %v366_v37 = vmul.f32 %v364_v29, %v1215_v14  ;;  %v359_v38 = vmul.f32 %v982_v43, %v357_v30 }
 0x164   :  { %v368_v45 = vadd.f32 1.4214138, %v366_v37  ;;  %v361_v46 = vmul.f32 1.0614054, %v359_v38  ;;  %v537_v37 = vperm.slane %v533_v16, 2  ;;  %v834_v16 = vld [vmem:[%s1356_s7 + $0x20] sm:$0xff] }
 0x166   :  { %v370_v52 = vmul.f32 %v368_v45, %v1215_v14  ;;  %v363_v53 = vadd.f32 -1.4531521, %v361_v46  ;;  %v986_v9 = vpop.eup %985 }
 0x168   :  { %v372_v59 = vadd.f32 -0.28449672, %v370_v52  ;;  %v365_v60 = vmul.f32 %v363_v53, %v359_v38 }
 0x16a   :  { %v374_v55 = vmul.f32 %v372_v59, %v1215_v14  ;;  %v367_v61 = vadd.f32 1.4214138, %v365_v60 }
 0x16c   :  { %v376_v56 = vadd.f32 0.2548296, %v374_v55  ;;  %v369_v63 = vmul.f32 %v367_v61, %v359_v38  ;;  %v840_v61 = vld [vmem:[%s1356_s7 + $0x50] sm:$0xff] }
 0x16e   :  { %v378_v0 = vmul.f32 %v376_v56, %v1215_v14  ;;  %v371_v1 = vadd.f32 -0.28449672, %v369_v63 }
 0x170   :  { %v388_v51 = vmul.f32 %v984_v2, %v378_v0  ;;  %v373_v3 = vmul.f32 %v371_v1, %v359_v38  ;;  %v839_v0 = vld [vmem:[%s1356_s7 + $0x48] sm:$0xff] }
 0x172   :  { %v390_v4 = vsub.f32 1.0, %v388_v51  ;;  %v375_v6 = vadd.f32 0.2548296, %v373_v3  ;;  %v838_v51 = vld [vmem:[%s1356_s7 + $0x40] sm:$0xff] }
 0x174   :  { %v398_v7 = vor.u32 %v394_v5, %v390_v4  ;;  %v377_v8 = vmul.f32 %v375_v6, %v359_v38  ;;  %v844_v38 = vld [vmem:[%s1356_s7 + $0x70] sm:$0xff]  ;;  %v837_v6 = vld [vmem:[%s1356_s7 + $0x38] sm:$0xff] }
 0x176   :  { %v402_v11 = vadd.f32 1.0, %v398_v7  ;;  %v387_v12 = vmul.f32 %v986_v9, %v377_v8  ;;  %v836_v9 = vld [vmem:[%s1356_s7 + $0x30] sm:$0xff] }
 0x178   :  { %v404_v13 = vmul.f32 %v402_v11, %v344_v10  ;;  %v389_v49 = vsub.f32 1.0, %v387_v12 }
 0x17a   :  { %v397_v14 = vor.u32 %v393_v50, %v389_v49  ;;  %579 = vmatmul.f32.vlgmr.msrb.gmra.mxu3 %v404_v13  ;;  %619 = vmatmul.f32.vlgmr.msra.gmra.mxu1 %v404_v13  ;;  %v835_v49 = vld [vmem:[%s1356_s7 + $0x28] sm:$0xff] }
 0x17c   :  { %v401_v43 = vadd.f32 1.0, %v397_v14 }
 0x17e   :  { %v403_v44 = vmul.f32 %v401_v43, %v343_v15 }
 0x180   :  { %559 = vmatmul.f32.vlgmr.msrb.gmra.mxu2 %v403_v44  ;;  %599 = vmatmul.f32.vlgmr.msra.gmra.mxu0 %v403_v44 }
 0x181   :  { %850 = vmatpush.msrb.mxu2 %v845_v32  ;;  %v832_v32 = vld [vmem:[%s1356_s7 + $0x10] sm:$0xff] }
 0x182   :  { %659 = vmatmul.f32.vlgmr.msra.gmra.mxu3 %v404_v13  ;;  %699 = vmatmul.f32.vlgmr.msrb.gmra.mxu1 %v404_v13 }
 0x183   :  { %851 = vmatpush.msrb.mxu2 %v844_v38  ;;  %v831_v38 = vld [vmem:[%s1356_s7 + $0x8] sm:$0xff] }
 0x185   :  { %852 = vmatpush.msrb.mxu2 %v843_v41 }
 0x187   :  { %853 = vmatpush.msrb.mxu2 %v842_v48 }
 0x188   :  { %639 = vmatmul.f32.vlgmr.msra.gmra.mxu2 %v403_v44  ;;  %679 = vmatmul.f32.vlgmr.msrb.gmra.mxu0 %v403_v44 }
 0x189   :  { %854 = vmatpush.msrb.mxu2 %v841_v58 }
 0x18b   :  { %855 = vmatpush.msrb.mxu2 %v840_v61 }
 0x18d   :  { %856 = vmatpush.msrb.mxu2 %v839_v0 }
 0x18f   :  { %857 = vmatpush.msrb.mxu2 %v838_v51 }
 0x191   :  { %858 = vmatpush.msrb.mxu2 %v837_v6 }
 0x193   :  { %859 = vmatpush.msrb.mxu2 %v836_v9 }
 0x195   :  { %860 = vmatpush.msrb.mxu2 %v835_v49 }
 0x197   :  { %861 = vmatpush.msrb.mxu2 %v834_v16 }
 0x1f7   :  { %v620_v42 = vpop.f32.mrf.mxu1 }
 0x1fd   :  { %v600_v17 = vpop.f32.mrf.mxu0  ;;  %v580_v23 = vpop.f32.mrf.mxu3 }
 0x1fe   :  { %v601_v18 = vadd.f32 %v600_v17, %v536_v22 }
 0x1ff   :  { %v700_v34 = vpop.f32.mrf.mxu1 }
 0x200   :  { %v1233_v19 = vadd.f32 %v620_v42, %v601_v18 }
 0x202   :  { %v1236_v36 = vmul.f32 0.70710677, %v1233_v19 }
 0x203   :  { %v560_v24 = vpop.f32.mrf.mxu2 }
 0x204   :  { %v1239_v25 = vand.u32 2147483647, %v1236_v36  ;;  %v561_v26 = vadd.f32 %v560_v24, %v535_v20 }
 0x205   :  { %v680_v27 = vpop.f32.mrf.mxu0  ;;  %v660_v52 = vpop.f32.mrf.mxu3 }
 0x206   :  { %v716_v29 = vmul.f32 0.3275911, %v1239_v25  ;;  %v1242_v30 = vadd.f32 %v580_v23, %v561_v26  ;;  %v681_v31 = vadd.f32 %v680_v27, %v538_v21  ;;  %v776_v14 = vsub.f32 0.0, %v1239_v25  ;;  %v833_v21 = vld [vmem:[%s1356_s7 + $0x18] sm:$0xff] }
 0x207   :  { %862 = vmatpush.msrb.mxu2 %v833_v21 }
 0x208   :  { %v720_v33 = vadd.f32 1.0, %v716_v29  ;;  %v1248_v35 = vmul.f32 0.70710677, %v1242_v30  ;;  %v1253_v39 = vadd.f32 %v700_v34, %v681_v31  ;;  %v780_v24 = vmul.f32 %v776_v14, %v1239_v25 }
 0x209   :  { %863 = vmatpush.msrb.mxu2 %v832_v32 }
 0x20a   :  { %987 = vrcp.f32 %v720_v33  ;;  %v1256_v40 = vand.u32 2147483647, %v1248_v35  ;;  %v1262_v45 = vmul.f32 0.70710677, %v1253_v39 }
 0x20b   :  { %v640_v46 = vpop.f32.mrf.mxu2  ;;  %864 = vmatpush.msrb.mxu2 %v831_v38 }
 0x20c   :  { %v715_v28 = vmul.f32 0.3275911, %v1256_v40  ;;  %v641_v47 = vadd.f32 %v640_v46, %v537_v37  ;;  %v1269_v53 = vand.u32 2147483647, %v1262_v45  ;;  %v775_v43 = vsub.f32 0.0, %v1256_v40 }
 0x20e   :  { %v719_v54 = vadd.f32 1.0, %v715_v28  ;;  %v1271_v57 = vadd.f32 %v660_v52, %v641_v47  ;;  %v718_v59 = vmul.f32 0.3275911, %v1269_v53  ;;  %v778_v20 = vsub.f32 0.0, %v1269_v53 }
 0x20f   :  { %v779_v29 = vmul.f32 %v775_v43, %v1256_v40  ;;  %v830_v40 = vld [vmem:[%s1356_s7] sm:$0xff]  ;;  %v785_v28 = vmul.f32 1.442695, %v780_v24  ;;  %v804_v24 = vand.u32 2147483648, %v1236_v36 }
 0x210   :  { %v988_v60 = vpop.eup %987  ;;  %989 = vrcp.f32 %v719_v54  ;;  %v1278_v55 = vmul.f32 0.70710677, %v1271_v57  ;;  %v722_v56 = vadd.f32 1.0, %v718_v59  ;;  %v782_v25 = vmul.f32 %v778_v20, %v1269_v53  ;;  %865 = vmatpush.msrb.mxu2 %v830_v40 }
 0x211   :  { %v728_v62 = vmul.f32 %v988_v60, %v720_v33  ;;  %v783_v52 = vmul.f32 1.442695, %v779_v29  ;;  %v803_v20 = vand.u32 2147483648, %v1248_v35  ;;  %v704_v40 = vmul.f32 0.5, %v1233_v19 }
 0x212   :  { %v1284_v63 = vand.u32 2147483647, %v1278_v55  ;;  %991 = vrcp.f32 %v722_v56 }
 0x213   :  { %v732_v1 = vsub.f32 2.0, %v728_v62  ;;  %v789_v62 = vmul.f32 1.442695, %v782_v25 }
 0x214   :  { %v717_v2 = vmul.f32 0.3275911, %v1284_v63  ;;  %v777_v58 = vsub.f32 0.0, %v1284_v63 }
 0x215   :  { %v1293_v3 = vmul.f32 %v988_v60, %v732_v1 }
 0x216   :  { %v990_v4 = vpop.eup %989  ;;  %v721_v5 = vadd.f32 1.0, %v717_v2  ;;  %v781_v2 = vmul.f32 %v777_v58, %v1284_v63 }
 0x217   :  { %v740_v7 = vmul.f32 1.0614054, %v1293_v3  ;;  %v727_v8 = vmul.f32 %v990_v4, %v719_v54 }
 0x218   :  { %993 = vrcp.f32 %v721_v5  ;;  %v992_v10 = vpop.eup %991 }
 0x219   :  { %v744_v11 = vadd.f32 -1.4531521, %v740_v7  ;;  %v731_v12 = vsub.f32 2.0, %v727_v8  ;;  %v730_v13 = vmul.f32 %v992_v10, %v722_v56  ;;  %995 = vpow2.f32 %v785_v28 }
 0x21a   :  { %997 = vpow2.f32 %v783_v52 }
 0x21b   :  { %v748_v50 = vmul.f32 %v744_v11, %v1293_v3  ;;  %v735_v15 = vmul.f32 %v990_v4, %v731_v12  ;;  %v734_v44 = vsub.f32 2.0, %v730_v13  ;;  %999 = vpow2.f32 %v789_v62 }
 0x21d   :  { %v752_v22 = vadd.f32 1.4214138, %v748_v50  ;;  %v739_v17 = vmul.f32 1.0614054, %v735_v15  ;;  %v738_v18 = vmul.f32 %v992_v10, %v734_v44  ;;  %v787_v10 = vmul.f32 1.442695, %v781_v2 }
 0x21e   :  { %v994_v42 = vpop.eup %993 }
 0x21f   :  { %v756_v23 = vmul.f32 %v752_v22, %v1293_v3  ;;  %v743_v26 = vadd.f32 -1.4531521, %v739_v17  ;;  %v729_v27 = vmul.f32 %v994_v42, %v721_v5  ;;  %v742_v31 = vmul.f32 1.0614054, %v738_v18  ;;  %v996_v11 = vpop.eup %995 }
 0x220   :  { %v998_v49 = vpop.eup %997  ;;  %1001 = vpow2.f32 %v787_v10 }
 0x221   :  { %v760_v33 = vadd.f32 -0.28449672, %v756_v23  ;;  %v747_v34 = vmul.f32 %v743_v26, %v735_v15  ;;  %v733_v37 = vsub.f32 2.0, %v729_v27  ;;  %v746_v41 = vadd.f32 -1.4531521, %v742_v31  ;;  %v1000_v63 = vpop.eup %999 }
 0x222   :  { %v806_v26 = vand.u32 2147483648, %v1262_v45  ;;  %v705_v45 = vmul.f32 0.5, %v1271_v57 }
 0x223   :  { %v764_v46 = vmul.f32 %v760_v33, %v1293_v3  ;;  %v751_v47 = vadd.f32 1.4214138, %v747_v34  ;;  %v737_v48 = vmul.f32 %v994_v42, %v733_v37  ;;  %v750_v54 = vmul.f32 %v746_v41, %v738_v18 }
 0x224   :  { %v805_v37 = vand.u32 2147483648, %v1278_v55  ;;  %v703_v41 = vmul.f32 0.5, %v1242_v30  ;;  %v968_v30 = vld [vmem:[%s1357_s8] ss:$0 sm:$0xff] }
 0x225   :  { %v755_v59 = vmul.f32 %v751_v47, %v735_v15  ;;  %v741_v60 = vmul.f32 1.0614054, %v737_v48  ;;  %v754_v61 = vadd.f32 1.4214138, %v750_v54  ;;  %v768_v53 = vadd.f32 0.2548296, %v764_v46 }
 0x226   :  { %v1002_v29 = vpop.eup %1001  ;;  %v706_v46 = vmul.f32 0.5, %v1253_v39 }
 0x227   :  { %v759_v56 = vadd.f32 -0.28449672, %v755_v59  ;;  %v745_v0 = vadd.f32 -1.4531521, %v741_v60  ;;  %v758_v1 = vmul.f32 %v754_v61, %v738_v18  ;;  %v772_v6 = vmul.f32 %v768_v53, %v1293_v3 }
 0x229   :  { %v763_v51 = vmul.f32 %v759_v56, %v735_v15  ;;  %v749_v4 = vmul.f32 %v745_v0, %v737_v48  ;;  %v762_v5 = vadd.f32 -0.28449672, %v758_v1  ;;  %v792_v14 = vmul.f32 %v996_v11, %v772_v6 }
 0x22b   :  { %v767_v7 = vadd.f32 0.2548296, %v763_v51  ;;  %v753_v8 = vadd.f32 1.4214138, %v749_v4  ;;  %v766_v9 = vmul.f32 %v762_v5, %v738_v18  ;;  %v796_v3 = vsub.f32 1.0, %v792_v14 }
 0x22d   :  { %v771_v12 = vmul.f32 %v767_v7, %v735_v15  ;;  %v757_v13 = vmul.f32 %v753_v8, %v737_v48  ;;  %v770_v50 = vadd.f32 0.2548296, %v766_v9  ;;  %v812_v31 = vor.u32 %v804_v24, %v796_v3  ;;  %v970_v3 = vld [vmem:[#allocation2] ss:$0 sm:$0xff] }
 0x22f   :  { %v791_v43 = vmul.f32 %v998_v49, %v771_v12  ;;  %v761_v44 = vadd.f32 -0.28449672, %v757_v13  ;;  %v774_v16 = vmul.f32 %v770_v50, %v738_v18  ;;  %v820_v38 = vadd.f32 1.0, %v812_v31 }
 0x231   :  { %v795_v22 = vsub.f32 1.0, %v791_v43  ;;  %v765_v17 = vmul.f32 %v761_v44, %v737_v48  ;;  %v794_v42 = vmul.f32 %v1000_v63, %v774_v16  ;;  %v824_v47 = vmul.f32 %v820_v38, %v704_v40  ;;  %v969_v63 = vld [vmem:[%s1358_s9] ss:$0 sm:$0xff] }
 0x233   :  { %v769_v21 = vadd.f32 0.2548296, %v765_v17  ;;  %v798_v23 = vsub.f32 1.0, %v794_v42  ;;  %v811_v15 = vor.u32 %v803_v20, %v795_v22 }
 0x235   :  { %v773_v27 = vmul.f32 %v769_v21, %v737_v48  ;;  %v814_v32 = vor.u32 %v806_v26, %v798_v23  ;;  %v819_v33 = vadd.f32 1.0, %v811_v15 }
 0x237   :  { %v793_v18 = vmul.f32 %v1002_v29, %v773_v27  ;;  %v822_v35 = vadd.f32 1.0, %v814_v32  ;;  %v823_v36 = vmul.f32 %v819_v33, %v703_v41 }
 0x239   :  { %v797_v34 = vsub.f32 1.0, %v793_v18  ;;  %v826_v48 = vmul.f32 %v822_v35, %v706_v46  ;;  %v827_v54 = vmax.f32 %v823_v36, %v824_v47 }
 0x23b   :  { %v813_v25 = vor.u32 %v805_v37, %v797_v34 }
 0x23d   :  { %v821_v28 = vadd.f32 1.0, %v813_v25 }
 0x23f   :  { %v825_v52 = vmul.f32 %v821_v28, %v705_v45 }
 0x241   :  { %v828_v58 = vmax.f32 %v825_v52, %v826_v48 }
 0x243   :  { %v829_v59 = vmax.f32 %v827_v54, %v828_v58 }
 0x245   :  { %866 = vmatmul.f32.vlgmr.msrb.gmra.mxu2 %v829_v59 }
 0x2c8   :  { %v867_v55 = vpop.f32.mrf.mxu2 }
 0x2c9   :  { %v868_v60 = vadd.f32 %v968_v30, %v867_v55 }
 0x2cb   :  { %v871_v19 = vmul.f32 0.70710677, %v868_v60  ;;  %v870_v44 = vmul.f32 0.5, %v868_v60 }
 0x2cd   :  { %v872_v61 = vand.u32 2147483647, %v871_v19  ;;  %v895_v50 = vand.u32 2147483648, %v871_v19 }
 0x2cf   :  { %v873_v62 = vmul.f32 0.3275911, %v872_v61  ;;  %v888_v1 = vsub.f32 0.0, %v872_v61 }
 0x2d1   :  { %v874_v39 = vadd.f32 1.0, %v873_v62  ;;  %v889_v4 = vmul.f32 %v888_v1, %v872_v61 }
 0x2d3   :  { %1003 = vrcp.f32 %v874_v39  ;;  %v890_v7 = vmul.f32 1.442695, %v889_v4 }
 0x2d5   :  { %1005 = vpow2.f32 %v890_v7 }
 0x2d9   :  { %v1004_v57 = vpop.eup %1003 }
 0x2da   :  { %v876_v53 = vmul.f32 %v1004_v57, %v874_v39 }
 0x2db   :  { %v1006_v13 = vpop.eup %1005 }
 0x2dc   :  { %v877_v56 = vsub.f32 2.0, %v876_v53 }
 0x2de   :  { %v878_v0 = vmul.f32 %v1004_v57, %v877_v56 }
 0x2e0   :  { %v879_v2 = vmul.f32 1.0614054, %v878_v0 }
 0x2e2   :  { %v880_v51 = vadd.f32 -1.4531521, %v879_v2 }
 0x2e4   :  { %v881_v5 = vmul.f32 %v880_v51, %v878_v0 }
 0x2e6   :  { %v882_v6 = vadd.f32 1.4214138, %v881_v5 }
 0x2e8   :  { %v883_v8 = vmul.f32 %v882_v6, %v878_v0 }
 0x2ea   :  { %v884_v9 = vadd.f32 -0.28449672, %v883_v8 }
 0x2ec   :  { %v885_v10 = vmul.f32 %v884_v9, %v878_v0 }
 0x2ee   :  { %v886_v11 = vadd.f32 0.2548296, %v885_v10 }
 0x2f0   :  { %v887_v12 = vmul.f32 %v886_v11, %v878_v0 }
 0x2f2   :  { %v892_v49 = vmul.f32 %v1006_v13, %v887_v12 }
 0x2f4   :  { %v893_v14 = vsub.f32 1.0, %v892_v49 }
 0x2f6   :  { %v897_v43 = vor.u32 %v895_v50, %v893_v14 }
 0x2f8   :  { %v899_v16 = vadd.f32 1.0, %v897_v43 }
 0x2fa   :  { %v900_v22 = vmul.f32 %v899_v16, %v870_v44 }
 0x2fc   :  { %v905_v17 = vmul.f32 %v969_v63, %v900_v22 }
 0x2fe   :  { %v907_v42 = vsel %vm906_vm1, %v905_v17, 0.0 }
 0x2ff   :  { %908 = vadd.xlane.f32.xlu0 %v907_v42 }
 0x372   :  { %v909_v20 = vpop.xlane.xlu0 %908 }
 0x373   :  { %v914_v21 = vadd.f32 %v970_v3, %v909_v20 }
 0x375   :  { %916 = vst.msk [vmem:[#allocation7] sm:$0xff] %vm915_vm2, %v914_v21 }
 0x37c   :  { %v935_v23 = vld [vmem:[#allocation7] sm:$0x3] }
 0x37d   :  { %936 = vst [vmem:[%s1360_s11] sm:$0x3] %v935_v23 }
 0x37e   :  { %954 = vsyncpa [#allocation4], 1 }
 0x37f   :  { %955 = vsyncpa [#allocation6], 1 }

</bundles_post_ra>
